<compile_context>
chip_gen: v5e
topology: v5e:2x2
jax: 0.10.0
libtpu: 0.0.40
codegen_flags: <defaults>
</compile_context>

<pallas_src>
import functools

import jax
import jax.numpy as jnp
from jax.experimental import pallas as pl
from jax.experimental.pallas import tpu as pltpu


# ------------------------------- kernel ---------------------------------------

def _avg_pool_2x2(v, stage_ref):
    """2x2 / stride-2 average pool of v:(R, W, C) -> (R//2, W//2, C). R, W even."""
    R, W, C = v.shape
    vh = v.reshape(R // 2, 2, W, C)
    stage_ref[...] = vh[:, 0] + vh[:, 1]                     # H-pool on the value
    return (stage_ref[:, pl.ds(0, W // 2, stride=2), :]      # W-pool via stride-2 reads
            + stage_ref[:, pl.ds(1, W // 2, stride=2), :]) * 0.25


def _disc_block_kernel(downsample, tile_h, W, cdt,
                       x_ref, w1_ref, b1_ref, w2_ref, b2_ref, wsc_ref, bsc_ref,
                       out_ref, acc1_ref, acc2_ref, h1pad_ref, *pool_refs):
    """One (batch, row-tile) grid step.

    x_ref   : (1, tile_h+4, W+2, Cin)  -- zero-padded in W, 2-row halo in H
    w1_ref  : (3, 3*Cin,  Cout)        -- per-dx weights, K index = dy*Cin + ci
    w2_ref  : (3, 3*Cout, Cout)
    wsc_ref : (Cin, Cout)              -- 1x1 shortcut (used only when downsampling)
    out_ref : (1, tile_h[/2], W[/2], Cout)
    """
    Cin = x_ref.shape[-1]
    Cout = w1_ref.shape[-1]
    R1 = tile_h + 2          # h1 rows carried (1-row halo each side)
    R2 = tile_h              # pre-pooling output rows of this tile

    # relu(x) once per tile (not once per conv tap).
    xr = jnp.maximum(x_ref[0], 0.0)                  # (tile_h+4, W+2, Cin)  f32
    xr_c = xr.astype(cdt)

    # ---- conv1: 3 im2col matmuls (K = 3*Cin), f32 accumulation in VMEM ------
    for dx in range(3):
        slab = xr_c[:, dx:dx + W, :]                                  # (tile_h+4, W, Cin)
        patch = jnp.concatenate(
            [slab[0:R1], slab[1:R1 + 1], slab[2:R1 + 2]], axis=-1)    # (R1, W, 3*Cin)
        contrib = jnp.dot(patch.reshape(R1 * W, 3 * Cin), w1_ref[dx],
                          preferred_element_type=jnp.float32)
        if dx == 0:
            acc1_ref[...] = contrib
        else:
            acc1_ref[...] += contrib

    h1 = jnp.maximum(acc1_ref[...] + b1_ref[...], 0.0)                # (R1*W, Cout) f32

    # Stage h1 for conv2 (zero-padded in W).  Zero only the two border columns,
    # and the halo rows only on image-boundary tiles.
    h1pad_ref[:, 1:W + 1, :] = h1.reshape(R1, W, Cout).astype(cdt)
    zcol = jnp.zeros((R1, 1, Cout), cdt)
    h1pad_ref[:, 0:1, :] = zcol
    h1pad_ref[:, W + 1:W + 2, :] = zcol

    t = pl.program_id(1)

    @pl.when(t == 0)
    def _():   # conv2 must see zeros above the first image row
        h1pad_ref[0:1, :, :] = jnp.zeros((1, W + 2, Cout), cdt)

    @pl.when(t == pl.num_programs(1) - 1)
    def _():   # ... and below the last image row
        h1pad_ref[R1 - 1:R1, :, :] = jnp.zeros((1, W + 2, Cout), cdt)

    # ---- conv2: 3 im2col matmuls (K = 3*Cout) --------------------------------
    h1p = h1pad_ref[...]
    for dx in range(3):
        slab = h1p[:, dx:dx + W, :]                                   # (R1, W, Cout)
        patch = jnp.concatenate(
            [slab[0:R2], slab[1:R2 + 1], slab[2:R2 + 2]], axis=-1)    # (R2, W, 3*Cout)
        contrib = jnp.dot(patch.reshape(R2 * W, 3 * Cout), w2_ref[dx],
                          preferred_element_type=jnp.float32)
        if dx == 0:
            acc2_ref[...] = contrib
        else:
            acc2_ref[...] += contrib

    h2 = (acc2_ref[...] + b2_ref[...]).reshape(R2, W, Cout)           # f32
    xr_int = xr[2:2 + R2, 1:W + 1, :]                                 # relu(x), interior

    if downsample:
        stage_h, stage_x = pool_refs
        h_p = _avg_pool_2x2(h2, stage_h)                              # (R2/2, W/2, Cout)
        x_p = _avg_pool_2x2(xr_int, stage_x)                          # (R2/2, W/2, Cin)
        # avg_pool(conv1x1(xr) + b) == conv1x1(avg_pool(xr)) + b  -> pool first.
        sc = (jnp.dot(x_p.reshape(-1, Cin).astype(cdt), wsc_ref[...],
                      preferred_element_type=jnp.float32)
              + bsc_ref[...]).reshape(R2 // 2, W // 2, Cout)
        out_ref[0] = h_p + sc
    else:
        out_ref[0] = h2 + xr_int     # module requires Cin == Cout in this branch


# ------------------------------- wrapper ---------------------------------------

def discriminator_block_pallas(x_nchw, params_oihw, downsample, *,
                               tile_h=8, compute_dtype=jnp.float32):
    """x_nchw: (N, Cin, H, W) f32; params are PyTorch-layout (OIHW) weights/biases."""
    w1, b1, w2, b2, wsc, bsc = params_oihw
    N, Cin, H, W = x_nchw.shape
    Cout = w1.shape[0]
    assert H % tile_h == 0, "H must be divisible by tile_h"
    if downsample:
        assert tile_h % 2 == 0 and W % 2 == 0
    else:
        assert Cin == Cout  # no 1x1 shortcut in the module when not downsampling

    cdt = compute_dtype
    T = H // tile_h
    rows = tile_h + 4        # 2-row conv halo each side

    # NCHW -> NHWC, zero-pad (H by 2, W by 1) and expand overlapping per-tile row windows.
    # TODO(synk): the halo gather duplicates (tile_h+4)/tile_h of x in HBM; a manual-DMA
    # (memory_space=pl.ANY) variant would avoid the copy at the cost of hand-rolled
    # double buffering.
    x = jnp.transpose(x_nchw, (0, 2, 3, 1)).astype(jnp.float32)
    xp = jnp.pad(x, ((0, 0), (2, 2), (1, 1), (0, 0)))
    row_idx = jnp.arange(T)[:, None] * tile_h + jnp.arange(rows)[None, :]
    x_halo = xp[:, row_idx].reshape(N, T * rows, W + 2, Cin)

    def pack_w(w_oihw):      # OIHW (Co, Ci, 3, 3) -> (dx, dy*Ci + ci, Co)
        co, ci = w_oihw.shape[0], w_oihw.shape[1]
        hwio = jnp.transpose(w_oihw, (2, 3, 1, 0))
        return jnp.transpose(hwio, (1, 0, 2, 3)).reshape(3, 3 * ci, co).astype(cdt)

    w1p = pack_w(w1)
    w2p = pack_w(w2)
    wscp = jnp.transpose(wsc.reshape(Cout, Cin), (1, 0)).astype(cdt)   # (Cin, Cout)
    b1r = b1.reshape(1, Cout).astype(jnp.float32)
    b2r = b2.reshape(1, Cout).astype(jnp.float32)
    bscr = bsc.reshape(1, Cout).astype(jnp.float32)

    Ho, Wo = (H // 2, W // 2) if downsample else (H, W)
    to = tile_h // 2 if downsample else tile_h

    scratch = [
        pltpu.VMEM(((tile_h + 2) * W, Cout), jnp.float32),    # conv1 accumulator
        pltpu.VMEM((tile_h * W, Cout), jnp.float32),          # conv2 accumulator
        pltpu.VMEM((tile_h + 2, W + 2, Cout), cdt),           # h1, zero-padded in W
    ]
    if downsample:
        scratch += [
            pltpu.VMEM((tile_h // 2, W, Cout), jnp.float32),  # W-pool staging (main)
            pltpu.VMEM((tile_h // 2, W, Cin), jnp.float32),   # W-pool staging (shortcut)
        ]

    kernel = functools.partial(_disc_block_kernel, downsample, tile_h, W, cdt)

    out_nhwc = pl.pallas_call(
        kernel,
        out_shape=jax.ShapeDtypeStruct((N, Ho, Wo, Cout), jnp.float32),
        grid=(N, T),
        in_specs=[
            pl.BlockSpec((1, rows, W + 2, Cin), lambda n, t: (n, t, 0, 0)),
            pl.BlockSpec(w1p.shape, lambda n, t: (0, 0, 0)),
            pl.BlockSpec(b1r.shape, lambda n, t: (0, 0)),
            pl.BlockSpec(w2p.shape, lambda n, t: (0, 0, 0)),
            pl.BlockSpec(b2r.shape, lambda n, t: (0, 0)),
            pl.BlockSpec(wscp.shape, lambda n, t: (0, 0)),
            pl.BlockSpec(bscr.shape, lambda n, t: (0, 0)),
        ],
        out_specs=pl.BlockSpec((1, to, Wo, Cout), lambda n, t: (n, t, 0, 0)),
        scratch_shapes=scratch,
        compiler_params=pltpu.CompilerParams(
            dimension_semantics=("parallel", "parallel")),
    )(x_halo, w1p, b1r, w2p, b2r, wscp, bscr)

    return jnp.transpose(out_nhwc, (0, 3, 1, 2))              # NHWC -> NCHW


# --------------------- deterministic parameter construction -------------------

def _xavier_uniform(key, shape_oihw, gain):
    cout, cin, kh, kw = shape_oihw
    fan_in, fan_out = cin * kh * kw, cout * kh * kw
    bound = gain * (6.0 / (fan_in + fan_out)) ** 0.5
    return jax.random.uniform(key, shape_oihw, jnp.float32, -bound, bound)


def _spectral_normalize(w_oihw, key, n_power_iter=1, eps=1e-12):
    """One power-iteration spectral norm (W / sigma), like torch spectral_norm."""
    cout = w_oihw.shape[0]
    w_mat = w_oihw.reshape(cout, -1)
    u = jax.random.normal(key, (cout,), jnp.float32)
    u = u / (jnp.linalg.norm(u) + eps)
    v = None
    for _ in range(n_power_iter):
        v = w_mat.T @ u
        v = v / (jnp.linalg.norm(v) + eps)
        u = w_mat @ v
        u = u / (jnp.linalg.norm(u) + eps)
    sigma = u @ (w_mat @ v)
    return w_oihw / sigma


def make_params(key, in_channels, out_channels, downsample):
    ks = jax.random.split(key, 8)
    w1 = _spectral_normalize(
        _xavier_uniform(ks[0], (out_channels, in_channels, 3, 3), 2 ** 0.5), ks[1])
    w2 = _spectral_normalize(
        _xavier_uniform(ks[2], (out_channels, out_channels, 3, 3), 2 ** 0.5), ks[3])
    b1 = 0.1 * jax.random.normal(ks[6], (out_channels,), jnp.float32)
    b2 = 0.1 * jax.random.normal(ks[7], (out_channels,), jnp.float32)
    if downsample:
        wsc = _spectral_normalize(
            _xavier_uniform(ks[4], (out_channels, in_channels, 1, 1), 1.0), ks[5])
        bsc = 0.1 * jax.random.normal(jax.random.fold_in(key, 99),
                                      (out_channels,), jnp.float32)
    else:
        wsc = jnp.zeros((out_channels, in_channels, 1, 1), jnp.float32)
        bsc = jnp.zeros((out_channels,), jnp.float32)
    return w1, b1, w2, b2, wsc, bsc    # OIHW, like PyTorch


# ----------------------------- pure-JAX reference -----------------------------

def _reference(x_nchw, params_oihw, downsample):
    w1, b1, w2, b2, wsc, bsc = params_oihw

    def conv(x, w, b, pad):
        y = jax.lax.conv_general_dilated(
            x, w, window_strides=(1, 1), padding=[(pad, pad), (pad, pad)],
            dimension_numbers=('NCHW', 'OIHW', 'NCHW'))
        return y + b.reshape(1, -1, 1, 1)

    def avg_pool(x):
        s = jax.lax.reduce_window(x, 0.0, jax.lax.add, (1, 1, 2, 2),
                                  (1, 1, 2, 2), 'VALID')
        return s * 0.25

    xr = jax.nn.relu(x_nchw)
    h = jax.nn.relu(conv(xr, w1, b1, 1))
    h = conv(h, w2, b2, 1)
    if downsample:
        h = avg_pool(h)
        sc = avg_pool(conv(xr, wsc, bsc, 0))
    else:
        sc = xr
    return h + sc


# ----------------------------------- main --------------------------------------

if __name__ == "__main__":
    key = jax.random.PRNGKey(0)
    k_x, k_p, k_x2, k_p2 = jax.random.split(key, 4)

    # --- config 1: downsampling block (Cin != Cout), f32 and bf16 compute ------
    N, Cin, Cout, H, W = 2, 4, 8, 16, 16
    x = jax.random.normal(k_x, (N, Cin, H, W), jnp.float32)
    params = make_params(k_p, Cin, Cout, True)
    ref = _reference(x, params, True)

    out_f32 = jax.block_until_ready(
        discriminator_block_pallas(x, params, True, tile_h=8,
                                   compute_dtype=jnp.float32))
    assert out_f32.shape == ref.shape, (out_f32.shape, ref.shape)
    err = float(jnp.max(jnp.abs(out_f32 - ref)))
    # tolerance accommodates TPU default matmul precision + the (exact-in-math)
    # pool-before-1x1 shortcut reordering
    assert jnp.allclose(out_f32, ref, atol=2e-2, rtol=2e-2), f"f32 max_err={err}"

    out_bf16 = jax.block_until_ready(
        discriminator_block_pallas(x, params, True, tile_h=8,
                                   compute_dtype=jnp.bfloat16))
    err_bf = float(jnp.max(jnp.abs(out_bf16 - ref)))
    assert jnp.allclose(out_bf16, ref, atol=1e-1, rtol=1e-1), f"bf16 max_err={err_bf}"

    # --- config 2: non-downsampling block (Cin == Cout), f32 -------------------
    C2 = 8
    x2 = jax.random.normal(k_x2, (N, C2, H, W), jnp.float32)
    params2 = make_params(k_p2, C2, C2, False)
    ref2 = _reference(x2, params2, False)
    out2 = jax.block_until_ready(
        discriminator_block_pallas(x2, params2, False, tile_h=8,
                                   compute_dtype=jnp.float32))
    err2 = float(jnp.max(jnp.abs(out2 - ref2)))
    assert jnp.allclose(out2, ref2, atol=1e-3, rtol=1e-3), f"no-ds max_err={err2}"

    print("KERNEL_OK")
</pallas_src>

<mosaic_0001>
module attributes {stable_mosaic.version = 11 : i64} {
  func.func @_disc_block_kernel(%arg0: i32, %arg1: i32, %arg2: memref<1x12x18x4xf32, #tpu.memory_space<vmem>>, %arg3: memref<3x12x8xf32, #tpu.memory_space<vmem>>, %arg4: memref<1x8xf32, #tpu.memory_space<vmem>>, %arg5: memref<3x24x8xf32, #tpu.memory_space<vmem>>, %arg6: memref<1x8xf32, #tpu.memory_space<vmem>>, %arg7: memref<4x8xf32, #tpu.memory_space<vmem>>, %arg8: memref<1x8xf32, #tpu.memory_space<vmem>>, %arg9: memref<1x4x8x8xf32, #tpu.memory_space<vmem>>, %arg10: memref<160x8xf32, #tpu.memory_space<vmem>>, %arg11: memref<128x8xf32, #tpu.memory_space<vmem>>, %arg12: memref<10x18x8xf32, #tpu.memory_space<vmem>>, %arg13: memref<4x16x8xf32, #tpu.memory_space<vmem>>, %arg14: memref<4x16x4xf32, #tpu.memory_space<vmem>>) attributes {dimension_semantics = [#tpu.dimension_semantics<parallel>, #tpu.dimension_semantics<parallel>], iteration_bounds = array<i64: 2, 2>, scalar_prefetch = 0 : i64, scratch_operands = 5 : i64, tpu.core_type = #tpu.core_type<tc>, window_params = [{transform_indices = @transform_0, window_bounds = array<i64: 1, 12, 18, 4>}, {pipeline_mode = #tpu.pipeline_mode<synchronous>, transform_indices = @transform_1, window_bounds = array<i64: 3, 12, 8>}, {pipeline_mode = #tpu.pipeline_mode<synchronous>, transform_indices = @transform_2, window_bounds = array<i64: 1, 8>}, {pipeline_mode = #tpu.pipeline_mode<synchronous>, transform_indices = @transform_3, window_bounds = array<i64: 3, 24, 8>}, {pipeline_mode = #tpu.pipeline_mode<synchronous>, transform_indices = @transform_4, window_bounds = array<i64: 1, 8>}, {pipeline_mode = #tpu.pipeline_mode<synchronous>, transform_indices = @transform_5, window_bounds = array<i64: 4, 8>}, {pipeline_mode = #tpu.pipeline_mode<synchronous>, transform_indices = @transform_6, window_bounds = array<i64: 1, 8>}, {transform_indices = @transform_7, window_bounds = array<i64: 1, 4, 8, 8>}]} {
    %c0 = arith.constant 0 : index
    %c0_0 = arith.constant 0 : index
    %c0_1 = arith.constant 0 : index
    %c0_2 = arith.constant 0 : index
    %0 = vector.load %arg2[%c0, %c0_0, %c0_1, %c0_2] : memref<1x12x18x4xf32, #tpu.memory_space<vmem>>, vector<1x12x18x4xf32>
    %1 = vector.shape_cast %0 : vector<1x12x18x4xf32> to vector<12x18x4xf32>
    %cst = arith.constant 0.000000e+00 : f32
    %2 = vector.broadcast %cst : f32 to vector<12x18x4xf32>
    %3 = arith.maximumf %1, %2 : vector<12x18x4xf32>
    %4 = vector.extract_strided_slice %3 {offsets = [0, 0, 0], sizes = [12, 16, 4], strides = [1, 1, 1]} : vector<12x18x4xf32> to vector<12x16x4xf32>
    %5 = vector.extract_strided_slice %4 {offsets = [0, 0, 0], sizes = [10, 16, 4], strides = [1, 1, 1]} : vector<12x16x4xf32> to vector<10x16x4xf32>
    %6 = vector.extract_strided_slice %4 {offsets = [1, 0, 0], sizes = [10, 16, 4], strides = [1, 1, 1]} : vector<12x16x4xf32> to vector<10x16x4xf32>
    %7 = vector.extract_strided_slice %4 {offsets = [2, 0, 0], sizes = [10, 16, 4], strides = [1, 1, 1]} : vector<12x16x4xf32> to vector<10x16x4xf32>
    %8 = tpu.concatenate %5, %6, %7 in 2 : vector<10x16x4xf32>, vector<10x16x4xf32>, vector<10x16x4xf32> -> vector<10x16x12xf32>
    %9 = vector.shape_cast %8 : vector<10x16x12xf32> to vector<160x12xf32>
    %c0_3 = arith.constant 0 : index
    %c0_4 = arith.constant 0 : index
    %c0_5 = arith.constant 0 : index
    %10 = vector.load %arg3[%c0_3, %c0_4, %c0_5] : memref<3x12x8xf32, #tpu.memory_space<vmem>>, vector<1x12x8xf32>
    %11 = vector.shape_cast %10 : vector<1x12x8xf32> to vector<12x8xf32>
    %cst_6 = arith.constant dense<0.000000e+00> : vector<160x8xf32>
    %12 = tpu.matmul %9, %11, %cst_6 {dimension_numbers = #tpu.dot_dimension_numbers<[1], [0], [0], [1], [0, 0, 1, 1], [], []>} : vector<160x12xf32>, vector<12x8xf32>, vector<160x8xf32> -> vector<160x8xf32>
    %c0_7 = arith.constant 0 : index
    %c0_8 = arith.constant 0 : index
    %13 = vector.load %arg10[%c0_7, %c0_8] : memref<160x8xf32, #tpu.memory_space<vmem>>, vector<160x8xf32>
    tpu.vector_store %arg10[%c0_7, %c0_8], %12 {strides = array<i32>} : memref<160x8xf32, #tpu.memory_space<vmem>>, vector<160x8xf32>,
    %14 = vector.extract_strided_slice %3 {offsets = [0, 1, 0], sizes = [12, 16, 4], strides = [1, 1, 1]} : vector<12x18x4xf32> to vector<12x16x4xf32>
    %15 = vector.extract_strided_slice %14 {offsets = [0, 0, 0], sizes = [10, 16, 4], strides = [1, 1, 1]} : vector<12x16x4xf32> to vector<10x16x4xf32>
    %16 = vector.extract_strided_slice %14 {offsets = [1, 0, 0], sizes = [10, 16, 4], strides = [1, 1, 1]} : vector<12x16x4xf32> to vector<10x16x4xf32>
    %17 = vector.extract_strided_slice %14 {offsets = [2, 0, 0], sizes = [10, 16, 4], strides = [1, 1, 1]} : vector<12x16x4xf32> to vector<10x16x4xf32>
    %18 = tpu.concatenate %15, %16, %17 in 2 : vector<10x16x4xf32>, vector<10x16x4xf32>, vector<10x16x4xf32> -> vector<10x16x12xf32>
    %19 = vector.shape_cast %18 : vector<10x16x12xf32> to vector<160x12xf32>
    %c1 = arith.constant 1 : index
    %c0_9 = arith.constant 0 : index
    %c0_10 = arith.constant 0 : index
    %20 = vector.load %arg3[%c1, %c0_9, %c0_10] : memref<3x12x8xf32, #tpu.memory_space<vmem>>, vector<1x12x8xf32>
    %21 = vector.shape_cast %20 : vector<1x12x8xf32> to vector<12x8xf32>
    %cst_11 = arith.constant dense<0.000000e+00> : vector<160x8xf32>
    %22 = tpu.matmul %19, %21, %cst_11 {dimension_numbers = #tpu.dot_dimension_numbers<[1], [0], [0], [1], [0, 0, 1, 1], [], []>} : vector<160x12xf32>, vector<12x8xf32>, vector<160x8xf32> -> vector<160x8xf32>
    %c0_12 = arith.constant 0 : index
    %c0_13 = arith.constant 0 : index
    %23 = vector.load %arg10[%c0_12, %c0_13] : memref<160x8xf32, #tpu.memory_space<vmem>>, vector<160x8xf32>
    %24 = arith.addf %23, %22 : vector<160x8xf32>
    %c0_14 = arith.constant 0 : index
    %c0_15 = arith.constant 0 : index
    %25 = vector.load %arg10[%c0_14, %c0_15] : memref<160x8xf32, #tpu.memory_space<vmem>>, vector<160x8xf32>
    tpu.vector_store %arg10[%c0_14, %c0_15], %24 {strides = array<i32>} : memref<160x8xf32, #tpu.memory_space<vmem>>, vector<160x8xf32>,
    %26 = vector.extract_strided_slice %3 {offsets = [0, 2, 0], sizes = [12, 16, 4], strides = [1, 1, 1]} : vector<12x18x4xf32> to vector<12x16x4xf32>
    %27 = vector.extract_strided_slice %26 {offsets = [0, 0, 0], sizes = [10, 16, 4], strides = [1, 1, 1]} : vector<12x16x4xf32> to vector<10x16x4xf32>
    %28 = vector.extract_strided_slice %26 {offsets = [1, 0, 0], sizes = [10, 16, 4], strides = [1, 1, 1]} : vector<12x16x4xf32> to vector<10x16x4xf32>
    %29 = vector.extract_strided_slice %26 {offsets = [2, 0, 0], sizes = [10, 16, 4], strides = [1, 1, 1]} : vector<12x16x4xf32> to vector<10x16x4xf32>
    %30 = tpu.concatenate %27, %28, %29 in 2 : vector<10x16x4xf32>, vector<10x16x4xf32>, vector<10x16x4xf32> -> vector<10x16x12xf32>
    %31 = vector.shape_cast %30 : vector<10x16x12xf32> to vector<160x12xf32>
    %c2 = arith.constant 2 : index
    %c0_16 = arith.constant 0 : index
    %c0_17 = arith.constant 0 : index
    %32 = vector.load %arg3[%c2, %c0_16, %c0_17] : memref<3x12x8xf32, #tpu.memory_space<vmem>>, vector<1x12x8xf32>
    %33 = vector.shape_cast %32 : vector<1x12x8xf32> to vector<12x8xf32>
    %cst_18 = arith.constant dense<0.000000e+00> : vector<160x8xf32>
    %34 = tpu.matmul %31, %33, %cst_18 {dimension_numbers = #tpu.dot_dimension_numbers<[1], [0], [0], [1], [0, 0, 1, 1], [], []>} : vector<160x12xf32>, vector<12x8xf32>, vector<160x8xf32> -> vector<160x8xf32>
    %c0_19 = arith.constant 0 : index
    %c0_20 = arith.constant 0 : index
    %35 = vector.load %arg10[%c0_19, %c0_20] : memref<160x8xf32, #tpu.memory_space<vmem>>, vector<160x8xf32>
    %36 = arith.addf %35, %34 : vector<160x8xf32>
    %c0_21 = arith.constant 0 : index
    %c0_22 = arith.constant 0 : index
    %37 = vector.load %arg10[%c0_21, %c0_22] : memref<160x8xf32, #tpu.memory_space<vmem>>, vector<160x8xf32>
    tpu.vector_store %arg10[%c0_21, %c0_22], %36 {strides = array<i32>} : memref<160x8xf32, #tpu.memory_space<vmem>>, vector<160x8xf32>,
    %c0_23 = arith.constant 0 : index
    %c0_24 = arith.constant 0 : index
    %38 = vector.load %arg10[%c0_23, %c0_24] : memref<160x8xf32, #tpu.memory_space<vmem>>, vector<160x8xf32>
    %c0_25 = arith.constant 0 : index
    %c0_26 = arith.constant 0 : index
    %39 = vector.load %arg4[%c0_25, %c0_26] : memref<1x8xf32, #tpu.memory_space<vmem>>, vector<1x8xf32>
    %40 = vector.broadcast %39 : vector<1x8xf32> to vector<160x8xf32>
    %41 = arith.addf %38, %40 : vector<160x8xf32>
    %cst_27 = arith.constant 0.000000e+00 : f32
    %42 = vector.broadcast %cst_27 : f32 to vector<160x8xf32>
    %43 = arith.maximumf %41, %42 : vector<160x8xf32>
    %44 = vector.shape_cast %43 : vector<160x8xf32> to vector<10x16x8xf32>
    %c0_28 = arith.constant 0 : index
    %c1_29 = arith.constant 1 : index
    %c0_30 = arith.constant 0 : index
    %45 = vector.load %arg12[%c0_28, %c1_29, %c0_30] : memref<10x18x8xf32, #tpu.memory_space<vmem>>, vector<10x16x8xf32>
    tpu.vector_store %arg12[%c0_28, %c1_29, %c0_30], %44 {strides = array<i32>} : memref<10x18x8xf32, #tpu.memory_space<vmem>>, vector<10x16x8xf32>,
    %cst_31 = arith.constant 0.000000e+00 : f32
    %46 = vector.broadcast %cst_31 : f32 to vector<10x1x8xf32>
    %c0_32 = arith.constant 0 : index
    %c0_33 = arith.constant 0 : index
    %c0_34 = arith.constant 0 : index
    %47 = vector.load %arg12[%c0_32, %c0_33, %c0_34] : memref<10x18x8xf32, #tpu.memory_space<vmem>>, vector<10x1x8xf32>
    tpu.vector_store %arg12[%c0_32, %c0_33, %c0_34], %46 {strides = array<i32>} : memref<10x18x8xf32, #tpu.memory_space<vmem>>, vector<10x1x8xf32>,
    %c0_35 = arith.constant 0 : index
    %c17 = arith.constant 17 : index
    %c0_36 = arith.constant 0 : index
    %48 = vector.load %arg12[%c0_35, %c17, %c0_36] : memref<10x18x8xf32, #tpu.memory_space<vmem>>, vector<10x1x8xf32>
    tpu.vector_store %arg12[%c0_35, %c17, %c0_36], %46 {strides = array<i32>} : memref<10x18x8xf32, #tpu.memory_space<vmem>>, vector<10x1x8xf32>,
    %c0_i32 = arith.constant 0 : i32
    %49 = arith.cmpi eq, %arg1, %c0_i32 : i32
    %50 = arith.extui %49 : i1 to i32
    %c0_i32_37 = arith.constant 0 : i32
    %51 = arith.cmpi ne, %50, %c0_i32_37 : i32
    scf.if %51 {
      %cst_97 = arith.constant 0.000000e+00 : f32
      %131 = vector.broadcast %cst_97 : f32 to vector<1x18x8xf32>
      %c0_98 = arith.constant 0 : index
      %c0_99 = arith.constant 0 : index
      %c0_100 = arith.constant 0 : index
      %132 = vector.load %arg12[%c0_98, %c0_99, %c0_100] : memref<10x18x8xf32, #tpu.memory_space<vmem>>, vector<1x18x8xf32>
      tpu.vector_store %arg12[%c0_98, %c0_99, %c0_100], %131 {strides = array<i32>} : memref<10x18x8xf32, #tpu.memory_space<vmem>>, vector<1x18x8xf32>,
    } else {
    }
    %c1_i32 = arith.constant 1 : i32
    %52 = arith.cmpi eq, %arg1, %c1_i32 : i32
    %53 = arith.extui %52 : i1 to i32
    %c0_i32_38 = arith.constant 0 : i32
    %54 = arith.cmpi ne, %53, %c0_i32_38 : i32
    scf.if %54 {
      %cst_97 = arith.constant 0.000000e+00 : f32
      %131 = vector.broadcast %cst_97 : f32 to vector<1x18x8xf32>
      %c9 = arith.constant 9 : index
      %c0_98 = arith.constant 0 : index
      %c0_99 = arith.constant 0 : index
      %132 = vector.load %arg12[%c9, %c0_98, %c0_99] : memref<10x18x8xf32, #tpu.memory_space<vmem>>, vector<1x18x8xf32>
      tpu.vector_store %arg12[%c9, %c0_98, %c0_99], %131 {strides = array<i32>} : memref<10x18x8xf32, #tpu.memory_space<vmem>>, vector<1x18x8xf32>,
    } else {
    }
    %c0_39 = arith.constant 0 : index
    %c0_40 = arith.constant 0 : index
    %c0_41 = arith.constant 0 : index
    %55 = vector.load %arg12[%c0_39, %c0_40, %c0_41] : memref<10x18x8xf32, #tpu.memory_space<vmem>>, vector<10x18x8xf32>
    %56 = vector.extract_strided_slice %55 {offsets = [0, 0, 0], sizes = [10, 16, 8], strides = [1, 1, 1]} : vector<10x18x8xf32> to vector<10x16x8xf32>
    %57 = vector.extract_strided_slice %56 {offsets = [0, 0, 0], sizes = [8, 16, 8], strides = [1, 1, 1]} : vector<10x16x8xf32> to vector<8x16x8xf32>
    %58 = vector.extract_strided_slice %56 {offsets = [1, 0, 0], sizes = [8, 16, 8], strides = [1, 1, 1]} : vector<10x16x8xf32> to vector<8x16x8xf32>
    %59 = vector.extract_strided_slice %56 {offsets = [2, 0, 0], sizes = [8, 16, 8], strides = [1, 1, 1]} : vector<10x16x8xf32> to vector<8x16x8xf32>
    %60 = tpu.concatenate %57, %58, %59 in 2 : vector<8x16x8xf32>, vector<8x16x8xf32>, vector<8x16x8xf32> -> vector<8x16x24xf32>
    %61 = vector.shape_cast %60 : vector<8x16x24xf32> to vector<128x24xf32>
    %c0_42 = arith.constant 0 : index
    %c0_43 = arith.constant 0 : index
    %c0_44 = arith.constant 0 : index
    %62 = vector.load %arg5[%c0_42, %c0_43, %c0_44] : memref<3x24x8xf32, #tpu.memory_space<vmem>>, vector<1x24x8xf32>
    %63 = vector.shape_cast %62 : vector<1x24x8xf32> to vector<24x8xf32>
    %cst_45 = arith.constant dense<0.000000e+00> : vector<128x8xf32>
    %64 = tpu.matmul %61, %63, %cst_45 {dimension_numbers = #tpu.dot_dimension_numbers<[1], [0], [0], [1], [0, 0, 1, 1], [], []>} : vector<128x24xf32>, vector<24x8xf32>, vector<128x8xf32> -> vector<128x8xf32>
    %c0_46 = arith.constant 0 : index
    %c0_47 = arith.constant 0 : index
    %65 = vector.load %arg11[%c0_46, %c0_47] : memref<128x8xf32, #tpu.memory_space<vmem>>, vector<128x8xf32>
    tpu.vector_store %arg11[%c0_46, %c0_47], %64 {strides = array<i32>} : memref<128x8xf32, #tpu.memory_space<vmem>>, vector<128x8xf32>,
    %66 = vector.extract_strided_slice %55 {offsets = [0, 1, 0], sizes = [10, 16, 8], strides = [1, 1, 1]} : vector<10x18x8xf32> to vector<10x16x8xf32>
    %67 = vector.extract_strided_slice %66 {offsets = [0, 0, 0], sizes = [8, 16, 8], strides = [1, 1, 1]} : vector<10x16x8xf32> to vector<8x16x8xf32>
    %68 = vector.extract_strided_slice %66 {offsets = [1, 0, 0], sizes = [8, 16, 8], strides = [1, 1, 1]} : vector<10x16x8xf32> to vector<8x16x8xf32>
    %69 = vector.extract_strided_slice %66 {offsets = [2, 0, 0], sizes = [8, 16, 8], strides = [1, 1, 1]} : vector<10x16x8xf32> to vector<8x16x8xf32>
    %70 = tpu.concatenate %67, %68, %69 in 2 : vector<8x16x8xf32>, vector<8x16x8xf32>, vector<8x16x8xf32> -> vector<8x16x24xf32>
    %71 = vector.shape_cast %70 : vector<8x16x24xf32> to vector<128x24xf32>
    %c1_48 = arith.constant 1 : index
    %c0_49 = arith.constant 0 : index
    %c0_50 = arith.constant 0 : index
    %72 = vector.load %arg5[%c1_48, %c0_49, %c0_50] : memref<3x24x8xf32, #tpu.memory_space<vmem>>, vector<1x24x8xf32>
    %73 = vector.shape_cast %72 : vector<1x24x8xf32> to vector<24x8xf32>
    %cst_51 = arith.constant dense<0.000000e+00> : vector<128x8xf32>
    %74 = tpu.matmul %71, %73, %cst_51 {dimension_numbers = #tpu.dot_dimension_numbers<[1], [0], [0], [1], [0, 0, 1, 1], [], []>} : vector<128x24xf32>, vector<24x8xf32>, vector<128x8xf32> -> vector<128x8xf32>
    %c0_52 = arith.constant 0 : index
    %c0_53 = arith.constant 0 : index
    %75 = vector.load %arg11[%c0_52, %c0_53] : memref<128x8xf32, #tpu.memory_space<vmem>>, vector<128x8xf32>
    %76 = arith.addf %75, %74 : vector<128x8xf32>
    %c0_54 = arith.constant 0 : index
    %c0_55 = arith.constant 0 : index
    %77 = vector.load %arg11[%c0_54, %c0_55] : memref<128x8xf32, #tpu.memory_space<vmem>>, vector<128x8xf32>
    tpu.vector_store %arg11[%c0_54, %c0_55], %76 {strides = array<i32>} : memref<128x8xf32, #tpu.memory_space<vmem>>, vector<128x8xf32>,
    %78 = vector.extract_strided_slice %55 {offsets = [0, 2, 0], sizes = [10, 16, 8], strides = [1, 1, 1]} : vector<10x18x8xf32> to vector<10x16x8xf32>
    %79 = vector.extract_strided_slice %78 {offsets = [0, 0, 0], sizes = [8, 16, 8], strides = [1, 1, 1]} : vector<10x16x8xf32> to vector<8x16x8xf32>
    %80 = vector.extract_strided_slice %78 {offsets = [1, 0, 0], sizes = [8, 16, 8], strides = [1, 1, 1]} : vector<10x16x8xf32> to vector<8x16x8xf32>
    %81 = vector.extract_strided_slice %78 {offsets = [2, 0, 0], sizes = [8, 16, 8], strides = [1, 1, 1]} : vector<10x16x8xf32> to vector<8x16x8xf32>
    %82 = tpu.concatenate %79, %80, %81 in 2 : vector<8x16x8xf32>, vector<8x16x8xf32>, vector<8x16x8xf32> -> vector<8x16x24xf32>
    %83 = vector.shape_cast %82 : vector<8x16x24xf32> to vector<128x24xf32>
    %c2_56 = arith.constant 2 : index
    %c0_57 = arith.constant 0 : index
    %c0_58 = arith.constant 0 : index
    %84 = vector.load %arg5[%c2_56, %c0_57, %c0_58] : memref<3x24x8xf32, #tpu.memory_space<vmem>>, vector<1x24x8xf32>
    %85 = vector.shape_cast %84 : vector<1x24x8xf32> to vector<24x8xf32>
    %cst_59 = arith.constant dense<0.000000e+00> : vector<128x8xf32>
    %86 = tpu.matmul %83, %85, %cst_59 {dimension_numbers = #tpu.dot_dimension_numbers<[1], [0], [0], [1], [0, 0, 1, 1], [], []>} : vector<128x24xf32>, vector<24x8xf32>, vector<128x8xf32> -> vector<128x8xf32>
    %c0_60 = arith.constant 0 : index
    %c0_61 = arith.constant 0 : index
    %87 = vector.load %arg11[%c0_60, %c0_61] : memref<128x8xf32, #tpu.memory_space<vmem>>, vector<128x8xf32>
    %88 = arith.addf %87, %86 : vector<128x8xf32>
    %c0_62 = arith.constant 0 : index
    %c0_63 = arith.constant 0 : index
    %89 = vector.load %arg11[%c0_62, %c0_63] : memref<128x8xf32, #tpu.memory_space<vmem>>, vector<128x8xf32>
    tpu.vector_store %arg11[%c0_62, %c0_63], %88 {strides = array<i32>} : memref<128x8xf32, #tpu.memory_space<vmem>>, vector<128x8xf32>,
    %c0_64 = arith.constant 0 : index
    %c0_65 = arith.constant 0 : index
    %90 = vector.load %arg11[%c0_64, %c0_65] : memref<128x8xf32, #tpu.memory_space<vmem>>, vector<128x8xf32>
    %c0_66 = arith.constant 0 : index
    %c0_67 = arith.constant 0 : index
    %91 = vector.load %arg6[%c0_66, %c0_67] : memref<1x8xf32, #tpu.memory_space<vmem>>, vector<1x8xf32>
    %92 = vector.broadcast %91 : vector<1x8xf32> to vector<128x8xf32>
    %93 = arith.addf %90, %92 : vector<128x8xf32>
    %94 = vector.shape_cast %93 : vector<128x8xf32> to vector<8x16x8xf32>
    %95 = vector.extract_strided_slice %3 {offsets = [2, 1, 0], sizes = [8, 16, 4], strides = [1, 1, 1]} : vector<12x18x4xf32> to vector<8x16x4xf32>
    %96 = vector.shape_cast %94 : vector<8x16x8xf32> to vector<4x2x16x8xf32>
    %97 = vector.extract_strided_slice %96 {offsets = [0, 0, 0, 0], sizes = [4, 1, 16, 8], strides = [1, 1, 1, 1]} : vector<4x2x16x8xf32> to vector<4x1x16x8xf32>
    %98 = vector.shape_cast %97 : vector<4x1x16x8xf32> to vector<4x16x8xf32>
    %99 = vector.extract_strided_slice %96 {offsets = [0, 1, 0, 0], sizes = [4, 1, 16, 8], strides = [1, 1, 1, 1]} : vector<4x2x16x8xf32> to vector<4x1x16x8xf32>
    %100 = vector.shape_cast %99 : vector<4x1x16x8xf32> to vector<4x16x8xf32>
    %101 = arith.addf %98, %100 : vector<4x16x8xf32>
    %c0_68 = arith.constant 0 : index
    %c0_69 = arith.constant 0 : index
    %c0_70 = arith.constant 0 : index
    %102 = vector.load %arg13[%c0_68, %c0_69, %c0_70] : memref<4x16x8xf32, #tpu.memory_space<vmem>>, vector<4x16x8xf32>
    tpu.vector_store %arg13[%c0_68, %c0_69, %c0_70], %101 {strides = array<i32>} : memref<4x16x8xf32, #tpu.memory_space<vmem>>, vector<4x16x8xf32>,
    %c0_71 = arith.constant 0 : index
    %c0_72 = arith.constant 0 : index
    %c0_73 = arith.constant 0 : index
    %103 = tpu.strided_load %arg13[%c0_71, %c0_72, %c0_73] {strides = array<i32: 1, 2, 1>} : memref<4x16x8xf32, #tpu.memory_space<vmem>>, vector<4x8x8xf32>
    %c0_74 = arith.constant 0 : index
    %c1_75 = arith.constant 1 : index
    %c0_76 = arith.constant 0 : index
    %104 = tpu.strided_load %arg13[%c0_74, %c1_75, %c0_76] {strides = array<i32: 1, 2, 1>} : memref<4x16x8xf32, #tpu.memory_space<vmem>>, vector<4x8x8xf32>
    %105 = arith.addf %103, %104 : vector<4x8x8xf32>
    %cst_77 = arith.constant 2.500000e-01 : f32
    %106 = vector.broadcast %cst_77 : f32 to vector<4x8x8xf32>
    %107 = arith.mulf %105, %106 : vector<4x8x8xf32>
    %108 = vector.shape_cast %95 : vector<8x16x4xf32> to vector<4x2x16x4xf32>
    %109 = vector.extract_strided_slice %108 {offsets = [0, 0, 0, 0], sizes = [4, 1, 16, 4], strides = [1, 1, 1, 1]} : vector<4x2x16x4xf32> to vector<4x1x16x4xf32>
    %110 = vector.shape_cast %109 : vector<4x1x16x4xf32> to vector<4x16x4xf32>
    %111 = vector.extract_strided_slice %108 {offsets = [0, 1, 0, 0], sizes = [4, 1, 16, 4], strides = [1, 1, 1, 1]} : vector<4x2x16x4xf32> to vector<4x1x16x4xf32>
    %112 = vector.shape_cast %111 : vector<4x1x16x4xf32> to vector<4x16x4xf32>
    %113 = arith.addf %110, %112 : vector<4x16x4xf32>
    %c0_78 = arith.constant 0 : index
    %c0_79 = arith.constant 0 : index
    %c0_80 = arith.constant 0 : index
    %114 = vector.load %arg14[%c0_78, %c0_79, %c0_80] : memref<4x16x4xf32, #tpu.memory_space<vmem>>, vector<4x16x4xf32>
    tpu.vector_store %arg14[%c0_78, %c0_79, %c0_80], %113 {strides = array<i32>} : memref<4x16x4xf32, #tpu.memory_space<vmem>>, vector<4x16x4xf32>,
    %c0_81 = arith.constant 0 : index
    %c0_82 = arith.constant 0 : index
    %c0_83 = arith.constant 0 : index
    %115 = tpu.strided_load %arg14[%c0_81, %c0_82, %c0_83] {strides = array<i32: 1, 2, 1>} : memref<4x16x4xf32, #tpu.memory_space<vmem>>, vector<4x8x4xf32>
    %c0_84 = arith.constant 0 : index
    %c1_85 = arith.constant 1 : index
    %c0_86 = arith.constant 0 : index
    %116 = tpu.strided_load %arg14[%c0_84, %c1_85, %c0_86] {strides = array<i32: 1, 2, 1>} : memref<4x16x4xf32, #tpu.memory_space<vmem>>, vector<4x8x4xf32>
    %117 = arith.addf %115, %116 : vector<4x8x4xf32>
    %cst_87 = arith.constant 2.500000e-01 : f32
    %118 = vector.broadcast %cst_87 : f32 to vector<4x8x4xf32>
    %119 = arith.mulf %117, %118 : vector<4x8x4xf32>
    %120 = vector.shape_cast %119 : vector<4x8x4xf32> to vector<32x4xf32>
    %c0_88 = arith.constant 0 : index
    %c0_89 = arith.constant 0 : index
    %121 = vector.load %arg7[%c0_88, %c0_89] : memref<4x8xf32, #tpu.memory_space<vmem>>, vector<4x8xf32>
    %cst_90 = arith.constant dense<0.000000e+00> : vector<32x8xf32>
    %122 = tpu.matmul %120, %121, %cst_90 {dimension_numbers = #tpu.dot_dimension_numbers<[1], [0], [0], [1], [0, 0, 1, 1], [], []>} : vector<32x4xf32>, vector<4x8xf32>, vector<32x8xf32> -> vector<32x8xf32>
    %c0_91 = arith.constant 0 : index
    %c0_92 = arith.constant 0 : index
    %123 = vector.load %arg8[%c0_91, %c0_92] : memref<1x8xf32, #tpu.memory_space<vmem>>, vector<1x8xf32>
    %124 = vector.broadcast %123 : vector<1x8xf32> to vector<32x8xf32>
    %125 = arith.addf %122, %124 : vector<32x8xf32>
    %126 = vector.shape_cast %125 : vector<32x8xf32> to vector<4x8x8xf32>
    %127 = arith.addf %107, %126 : vector<4x8x8xf32>
    %c0_93 = arith.constant 0 : index
    %c0_94 = arith.constant 0 : index
    %c0_95 = arith.constant 0 : index
    %c0_96 = arith.constant 0 : index
    %128 = vector.load %arg9[%c0_93, %c0_94, %c0_95, %c0_96] : memref<1x4x8x8xf32, #tpu.memory_space<vmem>>, vector<1x4x8x8xf32>
    %129 = vector.shape_cast %128 : vector<1x4x8x8xf32> to vector<4x8x8xf32>
    %130 = vector.shape_cast %127 : vector<4x8x8xf32> to vector<1x4x8x8xf32>
    tpu.vector_store %arg9[%c0_93, %c0_94, %c0_95, %c0_96], %130 {strides = array<i32>} : memref<1x4x8x8xf32, #tpu.memory_space<vmem>>, vector<1x4x8x8xf32>,
    return
  }
  func.func @transform_0(%arg0: i32, %arg1: i32) -> (i32, i32, i32, i32) {
    %c0_i32 = arith.constant 0 : i32
    %c0_i32_0 = arith.constant 0 : i32
    %c0_i32_1 = arith.constant 0 : i32
    return %arg0, %arg1, %c0_i32, %c0_i32_0 : i32, i32, i32, i32
  }
  func.func @transform_1(%arg0: i32, %arg1: i32) -> (i32, i32, i32) {
    %c0_i32 = arith.constant 0 : i32
    %c0_i32_0 = arith.constant 0 : i32
    %c0_i32_1 = arith.constant 0 : i32
    %c0_i32_2 = arith.constant 0 : i32
    return %c0_i32, %c0_i32_0, %c0_i32_1 : i32, i32, i32
  }
  func.func @transform_2(%arg0: i32, %arg1: i32) -> (i32, i32) {
    %c0_i32 = arith.constant 0 : i32
    %c0_i32_0 = arith.constant 0 : i32
    %c0_i32_1 = arith.constant 0 : i32
    return %c0_i32, %c0_i32_0 : i32, i32
  }
  func.func @transform_3(%arg0: i32, %arg1: i32) -> (i32, i32, i32) {
    %c0_i32 = arith.constant 0 : i32
    %c0_i32_0 = arith.constant 0 : i32
    %c0_i32_1 = arith.constant 0 : i32
    %c0_i32_2 = arith.constant 0 : i32
    return %c0_i32, %c0_i32_0, %c0_i32_1 : i32, i32, i32
  }
  func.func @transform_4(%arg0: i32, %arg1: i32) -> (i32, i32) {
    %c0_i32 = arith.constant 0 : i32
    %c0_i32_0 = arith.constant 0 : i32
    %c0_i32_1 = arith.constant 0 : i32
    return %c0_i32, %c0_i32_0 : i32, i32
  }
  func.func @transform_5(%arg0: i32, %arg1: i32) -> (i32, i32) {
    %c0_i32 = arith.constant 0 : i32
    %c0_i32_0 = arith.constant 0 : i32
    %c0_i32_1 = arith.constant 0 : i32
    return %c0_i32, %c0_i32_0 : i32, i32
  }
  func.func @transform_6(%arg0: i32, %arg1: i32) -> (i32, i32) {
    %c0_i32 = arith.constant 0 : i32
    %c0_i32_0 = arith.constant 0 : i32
    %c0_i32_1 = arith.constant 0 : i32
    return %c0_i32, %c0_i32_0 : i32, i32
  }
  func.func @transform_7(%arg0: i32, %arg1: i32) -> (i32, i32, i32, i32) {
    %c0_i32 = arith.constant 0 : i32
    %c0_i32_0 = arith.constant 0 : i32
    %c0_i32_1 = arith.constant 0 : i32
    return %arg0, %arg1, %c0_i32, %c0_i32_0 : i32, i32, i32, i32
  }
}

</mosaic_0001>

<bundles_post_ra>
// kernel: tpu_custom_call.1
= control target key start
LH: loop header
LB: loop body
LE: loop exit
PB: predicated region body
PF: predicated region fallthrough
CT: control target
= control target key end

     0   :  { %12 = vsyncpa [#allocation8], 0  ;;  %s4157_s0 = inlined_call_operand.vmem [shape: f32[2,24,18,4], index: 0, kind: input, shape index: {}]   ;;  %s4158_s1 = inlined_call_operand.vmem [shape: f32[3,12,8], index: 1, kind: input, shape index: {}]   ;;  %s4159_s2 = inlined_call_operand.vmem [shape: f32[1,8], index: 2, kind: input, shape index: {}]   ;;  %s4160_s3 = inlined_call_operand.vmem [shape: f32[3,24,8], index: 3, kind: input, shape index: {}]   ;;  %s4161_s4 = inlined_call_operand.vmem [shape: f32[1,8], index: 4, kind: input, shape index: {}]   ;;  %s4162_s5 = inlined_call_operand.vmem [shape: f32[4,8], index: 5, kind: input, shape index: {}]   ;;  %s4163_s6 = inlined_call_operand.vmem [shape: f32[1,8], index: 6, kind: input, shape index: {}]   ;;  %s4164_s7 = inlined_call_operand.hbm [shape: f32[2,8,8,8], index: 7, kind: output, shape index: {}]  }
   0x1   :  { %14 = vsyncpa [#allocation8 + $0x1], 0  ;;  %s2847_s24 = smov 0   ;;  %s2849_s25 = smov 0  }
   0x2   :  { %s2851_s26 = smov 0   ;;  %s2853_s27 = smov 0  }
   0x3   :  { %s2855_s28 = smov 0   ;;  %s2857_s29 = smov 0  }
   0x4   :  { %s2859_s30 = smov 0   ;;  %s2861_s8 = smov 0  }
   0x5 LB: > { %s2475_s9 = sadd.s32 4294967295, %s2798_s8   ;;  %s2476_s10 = sadd.s32 4294967294, %s2798_s8   ;;  %s2798_s8 = sphi %s2861_s8, %s20_s8   ;;  %s2794_s30 = sphi %s2859_s30, %s4228_s30   ;;  %s2790_s29 = sphi %s2857_s29, %s4227_s29   ;;  %s2786_s28 = sphi %s2855_s28, %s4226_s28   ;;  %s2782_s27 = sphi %s2853_s27, %s4225_s27   ;;  %s2778_s26 = sphi %s2851_s26, %s4224_s26   ;;  %s2774_s25 = sphi %s2849_s25, %s4223_s25   ;;  %s2770_s24 = sphi %s2847_s24, %s4222_s24  }
   0x6   : > { %s29_s11 = sadd.s32 1, %s2790_s29  ;;  %s32_s12 = sadd.s32 1, %s2794_s30 }
   0x7   : > { %p30_p0 = scmp.ge.s32.totalorder %s29_s11, 2  ;;  %p205_p1 = scmp.ne.s32.totalorder %s2778_s26, %s2774_s25 }
   0x8   : > { %p206_p2 = scmp.eq.s32.totalorder %s2475_s9, 3  ;;  %p211_p5 = scmp.ne.s32.totalorder %s2774_s25, %s2770_s24 }
   0x9   : > { %s4230_s11 = smov (%p30_p0, %s29_s11), 0  ;;  %s4232_s12 = smov (!%p30_p0, %s32_s12), %s2794_s30 }
   0xa   : > { %4189 = sst [smem:[#allocation10_spill]] %s4230_s11  ;;  %s191_s13 = ssub.s32 %s2790_s29, %s4230_s11 }
   0xb   : > { %p2898_p3 = por %p206_p2, %p205_p1  ;;  %p34_p4 = scmp.ge.s32.totalorder %s4232_s12, 2 }
   0xc   : > { %p212_p6 = scmp.eq.s32.totalorder %s2476_s10, 3  ;;  %p2479_p7 = scmp.ge.s32.totalorder %s2798_s8, 1 }
   0xd   : > { %s4234_s12 = smov (%p34_p4, %s4232_s12), 0  ;;  %p262_p9 = scmp.lt.s32.totalorder %s2798_s8, 5 }
   0xe   : > { %4191 = sst [smem:[#allocation11_spill]] %s4234_s12  ;;  %p2907_p8 = por %p212_p6, %p211_p5 }
   0xf   : > { %s190_s16 = ssub.s32 %s2794_s30, %s4234_s12  ;;  %s195_s17 = sadd.s32 1, %s2778_s26 }
  0x10   : > { %s192_s18 = sor.u32 %s191_s13, %s190_s16  ;;  %p263_p10 = pnand %p2479_p7, %p262_p9 }
  0x11   : > { %p193_p11 = scmp.eq.s32.totalorder %s192_s18, 0 }
  0x12   : > { %266 = sbr.rel (%p263_p10) target bundleno = 1054 (0x41e), region = 48 }
  0x13   : > { %s2916_s19 = scalar_select %p193_p11, %s2778_s26, %s195_s17  }
  0x17   : > { %s299_s20 = smul.u32 12, %s2782_s27  ;;  %p300_p12 = scmp.lt.s32.totalorder %s2786_s28, 1  ;;  %v568_v44 = vld [vmem:[%s4158_s1 + $0x8] sm:$0xf]  ;;  %vm630_vm0 = vcmask 1043456   ;;  %v567_v47 = vld [vmem:[%s4158_s1] sm:$0xff] }
  0x18   : > { %s2800_s16 = smov 4   ;;  %s2801_s11 = smov 8   ;;  %2616 = vmatpush.msk.msra.mxu2 %vm630_vm0, %v568_v44  ;;  %2482 = vmatpush.msk.msra.mxu0 %vm630_vm0, %v568_v44  ;;  %v2527_v51 = vld [vmem:[%s4158_s1 + $0x28] sm:$0xf]  ;;  %vm525_vm1 = vcmask 31744   ;;  %vm546_vm2 = vcmask 64512  }
  0x19   : > { %s301_s21 = scalar_select %p300_p12, %s2786_s28, 1  ;;  %vm569_vm3 = vcmask 97280   ;;  %vm832_vm4 = vcmask 1046528   ;;  %vm1066_vm5 = vcmask 1045504   ;;  %v2504_v44 = vld [vmem:[%s4158_s1 + $0x18] sm:$0xf] }
  0x1a   : > { %p302_p13 = scmp.lt.s32.totalorder %s299_s20, 23  ;;  %s296_s12 = sand.u32 1, %s2774_s25   ;;  %2617 = vmatpush.msra.mxu2 %v567_v47  ;;  %649 = vmatpush.msra.mxu0 %v567_v47  ;;  %vm1384_vm6 = vcmask 57344  }
  0x1b   : > { %s2622_s22 = smul.u32 72, %s301_s21  ;;  %s2972_s17 = sshll.u32 %s296_s12, 5  ;;  %2505 = vmatpush.msk.msra.mxu1 %vm630_vm0, %v2504_v44 }
  0x1c   : > { %s4236_s20 = smov (!%p302_p13, %s299_s20), 23  ;;  %2528 = vmatpush.msk.msrb.mxu2 %vm630_vm0, %v2527_v51  ;;  %p2549_p0 = scmp.ne.s32.totalorder %s2782_s27, 0 }
  0x1d   : > { %s2621_s23 = smul.u32 3, %s4236_s20 }
  0x1f   : > { %s306_s9 = sadd.s32 %s2622_s22, %s2621_s23 }
  0x20   : > { %s2481_s10 = sshll.u32 %s306_s9, 3  ;;  %s3555_s9 = scalar_lea.vmem [#allocation7], %s2972_s17 }
  0x21   : > { %s2924_s13 = scalar_lea.vmem %s4157_s0, %s2481_s10 }
  0x22   : > { %v333_v0 = vld [vmem:[%s2924_s13 + $0xb0] sm:$0xff]  ;;  %v332_v1 = vld [vmem:[%s2924_s13 + $0xa8] sm:$0xff]  ;;  %v335_v4 = vld [vmem:[%s2924_s13 + $0xc0] sm:$0xff] }
  0x23   : > { %v2928_v2 = vmax.f32 %v333_v0, 0.0  ;;  %v2930_v3 = vmax.f32 %v332_v1, 0.0  ;;  %v2933_v5 = vmax.f32 %v335_v4, 0.0  ;;  %v336_v6 = vld [vmem:[%s2924_s13 + $0xc8] sm:$0xff]  ;;  %v338_v7 = vld [vmem:[%s2924_s13 + $0xd8] sm:$0xff]  ;;  %v339_v10 = vld [vmem:[%s2924_s13 + $0xe0] sm:$0xff] }
  0x24   : > { %v2943_v8 = vmax.f32 %v336_v6, 0.0  ;;  %v2945_v9 = vmax.f32 %v338_v7, 0.0  ;;  %v2954_v11 = vmax.f32 %v339_v10, 0.0  ;;  %v341_v12 = vld [vmem:[%s2924_s13 + $0xf0] sm:$0xff]  ;;  %v342_v13 = vld [vmem:[%s2924_s13 + $0xf8] sm:$0xff]  ;;  %v344_v16 = vld [vmem:[%s2924_s13 + $0x108] sm:$0xff] }
  0x25   : > { %429 = vrot.lane.b32.xlu1 %v2928_v2, %s2800_s16  ;;  %427 = vrot.lane.b32.xlu0 %v2930_v3, %s2800_s16  ;;  %v377_v14 = vmax.f32 %v341_v12, 0.0  ;;  %v378_v15 = vmax.f32 %v342_v13, 0.0  ;;  %v380_v17 = vmax.f32 %v344_v16, 0.0  ;;  %v2977_v18 = vld [vmem:[%s2924_s13 + $0x20] sm:$0xff]  ;;  %v2980_v19 = vld [vmem:[%s2924_s13 + $0x18] sm:$0xff] }
  0x26   : > { %431 = vrot.lane.b32.xlu2 %v2933_v5, %s2800_s16  ;;  %4193 = vst [vmem:[#allocation12_spill] sm:$0xff] %v2943_v8  ;;  %v345_v20 = vld [vmem:[%s2924_s13 + $0x110] sm:$0xff]  ;;  %v351_v21 = vmax.f32 %v2977_v18, 0.0  ;;  %v350_v22 = vmax.f32 %v2980_v19, 0.0  ;;  %v318_v24 = vld [vmem:[%s2924_s13 + $0x38] sm:$0xff]  ;;  %v320_v33 = vld [vmem:[%s2924_s13 + $0x48] sm:$0xff] }
  0x27   : > { %4194 = vst [vmem:[#allocation13_spill] sm:$0xff] %v2945_v9  ;;  %v381_v23 = vmax.f32 %v345_v20, 0.0  ;;  %v317_v25 = vld [vmem:[%s2924_s13 + $0x30] sm:$0xff]  ;;  %v2996_v26 = vld [vmem:[%s2924_s13 + $0x28] sm:$0x3]  ;;  %v2998_v27 = vmax.f32 %v318_v24, 0.0 }
  0x28   : > { %4195 = vst [vmem:[#allocation14_spill] sm:$0xff] %v2954_v11  ;;  %v3000_v28 = vmax.f32 %v317_v25, 0.0  ;;  %v352_v29 = vmax.f32 %v2996_v26, 0.0  ;;  %v319_v30 = vld [vmem:[%s2924_s13 + $0x40] sm:$0x3]  ;;  %v321_v32 = vld [vmem:[%s2924_s13 + $0x50] sm:$0xff] }
  0x29   : > { %v3011_v31 = vmax.f32 %v319_v30, 0.0  ;;  %v3021_v34 = vmax.f32 %v321_v32, 0.0  ;;  %v3023_v35 = vmax.f32 %v320_v33, 0.0  ;;  %v322_v36 = vld [vmem:[%s2924_s13 + $0x58] sm:$0x3]  ;;  %v324_v38 = vld [vmem:[%s2924_s13 + $0x68] sm:$0xff] }
  0x2a   : > { %v3032_v37 = vmax.f32 %v322_v36, 0.0  ;;  %v323_v39 = vld [vmem:[%s2924_s13 + $0x60] sm:$0xff]  ;;  %v3042_v40 = vmax.f32 %v324_v38, 0.0  ;;  %v325_v42 = vld [vmem:[%s2924_s13 + $0x70] sm:$0x3]  ;;  %v326_v46 = vld [vmem:[%s2924_s13 + $0x78] sm:$0xff] }
  0x2b   : > { %v3044_v41 = vmax.f32 %v323_v39, 0.0  ;;  %v3053_v43 = vmax.f32 %v325_v42, 0.0  ;;  %v327_v45 = vld [vmem:[%s2924_s13 + $0x80] sm:$0xff]  ;;  %v3073_v50 = vmax.f32 %v326_v46, 0.0  ;;  %v328_v52 = vld [vmem:[%s2924_s13 + $0x88] sm:$0x3] }
  0x2c   : > { %v3071_v49 = vmax.f32 %v327_v45, 0.0  ;;  %v3086_v54 = vmax.f32 %v328_v52, 0.0  ;;  %v330_v55 = vld [vmem:[%s2924_s13 + $0x98] sm:$0xff]  ;;  %v329_v56 = vld [vmem:[%s2924_s13 + $0x90] sm:$0xff]  ;;  %v331_v60 = vld [vmem:[%s2924_s13 + $0xa0] sm:$0x3] }
  0x2d   : > { %491 = vrot.lane.b32.xlu1 %v2943_v8, %s2801_s11  ;;  %489 = vrot.lane.b32.xlu0 %v2933_v5, %s2801_s11  ;;  %v3096_v58 = vmax.f32 %v330_v55, 0.0  ;;  %v3098_v59 = vmax.f32 %v329_v56, 0.0  ;;  %v3107_v63 = vmax.f32 %v331_v60, 0.0  ;;  %v334_v32 = vld [vmem:[%s2924_s13 + $0xb8] sm:$0x3] }
  0x2e   : > { %493 = vrot.lane.b32.xlu2 %v2945_v9, %s2801_s11  ;;  %v3158_v45 = vmax.f32 %v334_v32, 0.0  ;;  %v337_v46 = vld [vmem:[%s2924_s13 + $0xd0] sm:$0x3] }
  0x35   : > { %495 = vrot.lane.b32.xlu1 %v2954_v11, %s2801_s11  ;;  %433 = vrot.lane.b32.xlu0 %v2943_v8, %s2800_s16 }
  0x36   : > { %435 = vrot.lane.b32.xlu2 %v2945_v9, %s2800_s16 }
  0x3d   : > { %437 = vrot.lane.b32.xlu1 %v2954_v11, %s2800_s16  ;;  %497 = vrot.lane.b32.xlu0 %v377_v14, %s2801_s11 }
  0x3e   : > { %499 = vrot.lane.b32.xlu2 %v378_v15, %s2801_s11 }
  0x45   : > { %501 = vrot.lane.b32.xlu1 %v380_v17, %s2801_s11  ;;  %439 = vrot.lane.b32.xlu0 %v377_v14, %s2800_s16  ;;  %v2526_v17 = vld [vmem:[%s4158_s1 + $0x20] sm:$0xff] }
  0x46   : > { %441 = vrot.lane.b32.xlu2 %v378_v15, %s2800_s16  ;;  %1178 = vmatpush.msrb.mxu2 %v2526_v17 }
  0x4d   : > { %405 = vrot.lane.b32.xlu1 %v351_v21, %s2800_s16  ;;  %403 = vrot.lane.b32.xlu0 %v350_v22, %s2800_s16 }
  0x4e   : > { %503 = vrot.lane.b32.xlu2 %v381_v23, %s2801_s11 }
  0x55   : > { %467 = vrot.lane.b32.xlu1 %v2998_v27, %s2801_s11  ;;  %465 = vrot.lane.b32.xlu0 %v3000_v28, %s2801_s11 }
  0x56   : > { %741 = vrot.lane.b32.xlu2 %v352_v29, %s2800_s16 }
  0x5d   : > { %407 = vrot.lane.b32.xlu1 %v3000_v28, %s2800_s16  ;;  %772 = vrot.lane.b32.xlu0 %v3011_v31, %s2801_s11 }
  0x5e   : > { %409 = vrot.lane.b32.xlu2 %v2998_v27, %s2800_s16 }
  0x65   : > { %471 = vrot.lane.b32.xlu1 %v3021_v34, %s2801_s11  ;;  %469 = vrot.lane.b32.xlu0 %v3023_v35, %s2801_s11 }
  0x66   : > { %743 = vrot.lane.b32.xlu2 %v3011_v31, %s2800_s16 }
  0x6d   : > { %411 = vrot.lane.b32.xlu1 %v3023_v35, %s2800_s16  ;;  %774 = vrot.lane.b32.xlu0 %v3032_v37, %s2801_s11 }
  0x6e   : > { %413 = vrot.lane.b32.xlu2 %v3021_v34, %s2800_s16 }
  0x75   : > { %475 = vrot.lane.b32.xlu1 %v3042_v40, %s2801_s11  ;;  %473 = vrot.lane.b32.xlu0 %v3044_v41, %s2801_s11 }
  0x76   : > { %745 = vrot.lane.b32.xlu2 %v3032_v37, %s2800_s16 }
  0x7d   : > { %415 = vrot.lane.b32.xlu1 %v3044_v41, %s2800_s16  ;;  %776 = vrot.lane.b32.xlu0 %v3053_v43, %s2801_s11 }
  0x7e   : > { %417 = vrot.lane.b32.xlu2 %v3042_v40, %s2800_s16 }
  0x80   : > { %v432_v48 = vpop.permute.xlu2 %431 }
  0x81   : > { %v540_v20 = vsel %vm525_vm1, %v2930_v3, %v432_v48  ;;  %v2503_v48 = vld [vmem:[%s4158_s1 + $0x10] sm:$0xff] }
  0x82   : > { %944 = vmatpush.msra.mxu1 %v2503_v48 }
  0x85   : > { %479 = vrot.lane.b32.xlu1 %v3071_v49, %s2801_s11  ;;  %477 = vrot.lane.b32.xlu0 %v3073_v50, %s2801_s11 }
  0x86   : > { %747 = vrot.lane.b32.xlu2 %v3053_v43, %s2800_s16 }
  0x88   : > { %v494_v53 = vpop.permute.xlu2 %493 }
  0x89   : > { %v561_v30 = vsel %vm546_vm2, %v540_v20, %v494_v53  ;;  %v3170_v53 = vmax.f32 %v337_v46, 0.0 }
  0x8a   : > { %v868_v39 = vrot.slane %v561_v30, 1  ;;  %v1102_v42 = vrot.slane %v561_v30, 2 }
  0x8b   : > { %4196 = vst [vmem:[#allocation15_spill] sm:$0xff] %v3170_v53 }
  0x8d   : > { %419 = vrot.lane.b32.xlu1 %v3073_v50, %s2800_s16  ;;  %778 = vrot.lane.b32.xlu0 %v3086_v54, %s2801_s11 }
  0x8e   : > { %421 = vrot.lane.b32.xlu2 %v3071_v49, %s2800_s16 }
  0x90   : > { %v436_v57 = vpop.permute.xlu2 %435 }
  0x91   : > { %v542_v60 = vsel %vm525_vm1, %v2933_v5, %v436_v57 }
  0x95   : > { %483 = vrot.lane.b32.xlu1 %v3096_v58, %s2801_s11  ;;  %481 = vrot.lane.b32.xlu0 %v3098_v59, %s2801_s11 }
  0x96   : > { %749 = vrot.lane.b32.xlu2 %v3086_v54, %s2800_s16 }
  0x97   : > { %v430_v61 = vpop.permute.xlu1 %429  ;;  %v428_v62 = vpop.permute.xlu0 %427 }
  0x98   : > { %v3109_v0 = vpop.permute.xlu2 %499  ;;  %v539_v1 = vsel %vm525_vm1, %v3096_v58, %v430_v61  ;;  %v538_v4 = vsel %vm525_vm1, %v3098_v59, %v428_v62  ;;  %v340_v61 = vld [vmem:[%s2924_s13 + $0xe8] sm:$0x3] }
  0x99   : > { %v3195_v57 = vmax.f32 %v340_v61, 0.0 }
  0x9b   : > { %4197 = vst [vmem:[#allocation16_spill] sm:$0xff] %v3195_v57 }
  0x9d   : > { %423 = vrot.lane.b32.xlu1 %v3098_v59, %s2800_s16  ;;  %780 = vrot.lane.b32.xlu0 %v3107_v63, %s2801_s11 }
  0x9e   : > { %425 = vrot.lane.b32.xlu2 %v3096_v58, %s2800_s16 }
  0x9f   : > { %v492_v6 = vpop.permute.xlu1 %491  ;;  %v490_v7 = vpop.permute.xlu0 %489 }
  0xa0   : > { %v559_v10 = vsel %vm546_vm2, %v538_v4, %v490_v7  ;;  %v3123_v12 = vsel %vm546_vm2, %v539_v1, %v492_v6  ;;  %v442_v25 = vpop.permute.xlu2 %441 }
  0xa1   : > { %2495 = vmatmul.msk.f32.vlgmr.msra.gmra.mxu2 %vm569_vm3, %v559_v10  ;;  %v863_v13 = vrot.slane %v559_v10, 1  ;;  %v1097_v14 = vrot.slane %v559_v10, 2  ;;  %v864_v15 = vrot.slane %v3123_v12, 1  ;;  %v1098_v16 = vrot.slane %v3123_v12, 2 }
  0xa2   : > { %v545_v17 = vsel %vm525_vm1, %v2954_v11, %v442_v25  ;;  %v343_v25 = vld [vmem:[%s2924_s13 + $0x100] sm:$0x3] }
  0xa3   : > { %v3136_v23 = vsel %vm832_vm4, %v863_v13, %v864_v15  ;;  %v3141_v24 = vsel %vm1066_vm5, %v1097_v14, %v1098_v16 }
  0xa5   : > { %487 = vrot.lane.b32.xlu1 %v2928_v2, %s2801_s11  ;;  %485 = vrot.lane.b32.xlu0 %v2930_v3, %s2801_s11 }
  0xa6   : > { %751 = vrot.lane.b32.xlu2 %v3107_v63, %s2800_s16 }
  0xa7   : > { %v496_v33 = vpop.permute.xlu1 %495  ;;  %v434_v36 = vpop.permute.xlu0 %433 }
  0xa8   : > { %v541_v38 = vsel %vm525_vm1, %v2928_v2, %v434_v36  ;;  %v504_v62 = vpop.permute.xlu2 %503 }
  0xa9   : > { %2496 = vmatmul.msk.f32.gmra.mxu2 %vm569_vm3, %v3123_v12  ;;  %v3162_v47 = vsel %vm546_vm2, %v541_v38, %v496_v33 }
  0xaa   : > { %v869_v51 = vrot.slane %v3162_v47, 1  ;;  %v4170_v52 = vrot.slane %v3162_v47, 2 }
  0xac   : > { %v3175_v55 = vsel %vm832_vm4, %v868_v39, %v869_v51  ;;  %v3180_v56 = vsel %vm1066_vm5, %v1102_v42, %v4170_v52  ;;  %v346_v39 = vld [vmem:[%s2924_s13 + $0x118] sm:$0x3] }
  0xad   : > { %753 = vrot.lane.b32.xlu1 %v3158_v45, %s2800_s16  ;;  %782 = vrot.lane.b32.xlu0 %v3158_v45, %s2801_s11 }
  0xae   : > { %784 = vrot.lane.b32.xlu2 %v3170_v53, %s2801_s11 }
  0xaf   : > { %v438_v1 = vpop.permute.xlu1 %437  ;;  %v498_v4 = vpop.permute.xlu0 %497 }
  0xb0   : > { %v543_v6 = vsel %vm525_vm1, %v2943_v8, %v438_v1  ;;  %v563_v7 = vsel %vm546_vm2, %v542_v60, %v498_v4  ;;  %v742_v44 = vpop.permute.xlu2 %741  ;;  %v379_v60 = vmax.f32 %v343_v25, 0.0  ;;  %v382_v4 = vmax.f32 %v346_v39, 0.0 }
  0xb1   : > { %2497 = vmatmul.msk.f32.gmra.mxu2 %vm569_vm3, %v561_v30  ;;  %v873_v10 = vrot.slane %v563_v7, 1  ;;  %v1107_v13 = vrot.slane %v563_v7, 2  ;;  %v3199_v14 = vsel %vm546_vm2, %v543_v6, %v3109_v0  ;;  %v3220_v0 = vsel %vm546_vm2, %v545_v17, %v504_v62  ;;  %v311_v17 = vld [vmem:[%s2924_s13] sm:$0xff] }
  0xb2   : > { %v4171_v20 = vrot.slane %v3199_v14, 1  ;;  %v4168_v32 = vrot.slane %v3199_v14, 2  ;;  %v4169_v46 = vrot.slane %v3220_v0, 1  ;;  %v4167_v48 = vrot.slane %v3220_v0, 2 }
  0xb3   : > { %v347_v39 = vmax.f32 %v311_v17, 0.0 }
  0xb4   : > { %v3208_v30 = vsel %vm832_vm4, %v873_v10, %v4171_v20  ;;  %v3213_v33 = vsel %vm1066_vm5, %v1107_v13, %v4168_v32  ;;  %v312_v13 = vld [vmem:[%s2924_s13 + $0x8] sm:$0xff] }
  0xb5   : > { %786 = vrot.lane.b32.xlu1 %v3195_v57, %s2801_s11  ;;  %755 = vrot.lane.b32.xlu0 %v3170_v53, %s2800_s16 }
  0xb6   : > { %757 = vrot.lane.b32.xlu2 %v3195_v57, %s2800_s16 }
  0xb7   : > { %v502_v36 = vpop.permute.xlu1 %501  ;;  %v440_v38 = vpop.permute.xlu0 %439 }
  0xb8   : > { %v544_v42 = vsel %vm525_vm1, %v2945_v9, %v440_v38  ;;  %v348_v38 = vmax.f32 %v312_v13, 0.0 }
  0xb9   : > { %2498 = vmatmul.msk.f32.gmra.mxu2 %vm569_vm3, %v3162_v47  ;;  %v565_v61 = vsel %vm546_vm2, %v544_v42, %v502_v36  ;;  %v410_v42 = vpop.permute.xlu2 %409 }
  0xba   : > { %v878_v62 = vrot.slane %v565_v61, 1  ;;  %v1112_v1 = vrot.slane %v565_v61, 2 }
  0xbc   : > { %v3236_v6 = vsel %vm832_vm4, %v878_v62, %v4169_v46  ;;  %v3241_v10 = vsel %vm1066_vm5, %v1112_v1, %v4167_v48  ;;  %v313_v48 = vld [vmem:[%s2924_s13 + $0x10] sm:$0x3] }
  0xbd   : > { %759 = vrot.lane.b32.xlu1 %v379_v60, %s2800_s16  ;;  %788 = vrot.lane.b32.xlu0 %v379_v60, %s2801_s11 }
  0xbe   : > { %790 = vrot.lane.b32.xlu2 %v382_v4, %s2801_s11  ;;  %v349_v4 = vmax.f32 %v313_v48, 0.0 }
  0xbf   : > { %v406_v25 = vpop.permute.xlu1 %405  ;;  %v404_v36 = vpop.permute.xlu0 %403 }
  0xc0   : > { %v527_v62 = vsel %vm525_vm1, %v348_v38, %v406_v25  ;;  %v526_v1 = vsel %vm525_vm1, %v347_v39, %v404_v36  ;;  %v802_v25 = vsel %vm525_vm1, %v349_v4, %v742_v44  ;;  %v529_v44 = vsel %vm525_vm1, %v351_v21, %v410_v42 }
  0xc1   : > { %2499 = vmatmul.msk.f32.gmra.mxu2 %vm569_vm3, %v563_v7  ;;  %v744_v17 = vpop.permute.xlu2 %743 }
  0xc2   : > { %v803_v21 = vsel %vm525_vm1, %v352_v29, %v744_v17 }
  0xc7   : > { %v468_v32 = vpop.permute.xlu1 %467  ;;  %v466_v46 = vpop.permute.xlu0 %465 }
  0xc8   : > { %v548_v60 = vsel %vm546_vm2, %v527_v62, %v468_v32  ;;  %v547_v52 = vsel %vm546_vm2, %v526_v1, %v466_v46 }
  0xc9   : > { %v834_v20 = vrot.slane %v548_v60, 1  ;;  %2483 = vmatmul.msk.f32.vlgmr.msra.gmra.mxu0 %vm569_vm3, %v547_v52  ;;  %v833_v13 = vrot.slane %v547_v52, 1  ;;  %2500 = vmatmul.msk.f32.gmra.mxu2 %vm569_vm3, %v3199_v14  ;;  %v414_v62 = vpop.permute.xlu2 %413  ;;  %v1067_v18 = vrot.slane %v547_v52, 2 }
  0xca   : > { %v531_v29 = vsel %vm525_vm1, %v2998_v27, %v414_v62 }
  0xcb   : > { %v835_v7 = vsel %vm832_vm4, %v833_v13, %v834_v20 }
  0xcc   : > { %2506 = vmatmul.msk.f32.vlgmr.msra.gmra.mxu1 %vm569_vm3, %v835_v7 }
  0xcf   : > { %v408_v36 = vpop.permute.xlu1 %407  ;;  %v773_v38 = vpop.permute.xlu0 %772 }
  0xd0   : > { %v812_v32 = vsel %vm546_vm2, %v802_v25, %v773_v38  ;;  %v528_v39 = vsel %vm525_vm1, %v350_v22, %v408_v36  ;;  %v1068_v22 = vrot.slane %v548_v60, 2 }
  0xd1   : > { %v836_v46 = vrot.slane %v812_v32, 1  ;;  %2484 = vmatmul.msk.f32.gmra.mxu0 %vm569_vm3, %v548_v60  ;;  %2501 = vmatmul.msk.f32.gmra.mxu2 %vm569_vm3, %v565_v61  ;;  %v1070_v60 = vrot.slane %v812_v32, 2 }
  0xd2   : > { %v1069_v38 = vsel %vm1066_vm5, %v1067_v18, %v1068_v22 }
  0xd3   : > { %v837_v48 = vsel %vm832_vm4, %v834_v20, %v836_v46  ;;  %v746_v46 = vpop.permute.xlu2 %745 }
  0xd4   : > { %2507 = vmatmul.msk.f32.gmra.mxu1 %vm569_vm3, %v837_v48  ;;  %v804_v62 = vsel %vm525_vm1, %v3011_v31, %v746_v46 }
  0xd7   : > { %v472_v1 = vpop.permute.xlu1 %471  ;;  %v470_v4 = vpop.permute.xlu0 %469 }
  0xd8   : > { %v550_v13 = vsel %vm546_vm2, %v529_v44, %v472_v1  ;;  %v549_v7 = vsel %vm546_vm2, %v528_v39, %v470_v4  ;;  %v1071_v4 = vsel %vm1066_vm5, %v1068_v22, %v1070_v60 }
  0xd9   : > { %v839_v61 = vrot.slane %v550_v13, 1  ;;  %v838_v25 = vrot.slane %v549_v7, 1  ;;  %2502 = vmatmul.msk.f32.gmra.mxu2 %vm569_vm3, %v3220_v0  ;;  %2485 = vmatmul.msk.f32.gmra.mxu0 %vm569_vm3, %v549_v7  ;;  %v1073_v18 = vrot.slane %v550_v13, 2 }
  0xdb   : > { %v840_v19 = vsel %vm832_vm4, %v838_v25, %v839_v61  ;;  %v418_v32 = vpop.permute.xlu2 %417 }
  0xdc   : > { %2508 = vmatmul.msk.f32.gmra.mxu1 %vm569_vm3, %v840_v19  ;;  %v533_v60 = vsel %vm525_vm1, %v3021_v34, %v418_v32 }
  0xdf   : > { %v412_v20 = vpop.permute.xlu1 %411  ;;  %v775_v42 = vpop.permute.xlu0 %774 }
  0xe0   : > { %v813_v36 = vsel %vm546_vm2, %v803_v21, %v775_v42  ;;  %v530_v26 = vsel %vm525_vm1, %v3000_v28, %v412_v20  ;;  %v1072_v21 = vrot.slane %v549_v7, 2 }
  0xe1   : > { %v841_v48 = vrot.slane %v813_v36, 1  ;;  %2529 = vmatmul.msk.f32.vlgmr.msrb.gmra.mxu2 %vm569_vm3, %v1069_v38  ;;  %2486 = vmatmul.msk.f32.gmra.mxu0 %vm569_vm3, %v550_v13  ;;  %v1075_v13 = vrot.slane %v813_v36, 2 }
  0xe2   : > { %v1074_v38 = vsel %vm1066_vm5, %v1072_v21, %v1073_v18 }
  0xe3   : > { %v842_v52 = vsel %vm832_vm4, %v839_v61, %v841_v48  ;;  %v748_v7 = vpop.permute.xlu2 %747 }
  0xe4   : > { %2509 = vmatmul.msk.f32.gmra.mxu1 %vm569_vm3, %v842_v52  ;;  %v805_v32 = vsel %vm525_vm1, %v3032_v37, %v748_v7 }
  0xe7   : > { %v476_v17 = vpop.permute.xlu1 %475  ;;  %v474_v39 = vpop.permute.xlu0 %473 }
  0xe8   : > { %v552_v44 = vsel %vm546_vm2, %v531_v29, %v476_v17  ;;  %v551_v1 = vsel %vm546_vm2, %v530_v26, %v474_v39 }
  0xe9   : > { %v844_v25 = vrot.slane %v552_v44, 1  ;;  %v843_v19 = vrot.slane %v551_v1, 1  ;;  %2530 = vmatmul.msk.f32.gmra.mxu2 %vm569_vm3, %v1071_v4  ;;  %2487 = vmatmul.msk.f32.gmra.mxu0 %vm569_vm3, %v551_v1  ;;  %v1076_v4 = vsel %vm1066_vm5, %v1073_v18, %v1075_v13  ;;  %v1077_v21 = vrot.slane %v551_v1, 2 }
  0xeb   : > { %v845_v61 = vsel %vm832_vm4, %v843_v19, %v844_v25 }
  0xec   : > { %2510 = vmatmul.msk.f32.gmra.mxu1 %vm569_vm3, %v845_v61  ;;  %v1078_v61 = vrot.slane %v552_v44, 2 }
  0xef   : > { %v416_v20 = vpop.permute.xlu1 %415  ;;  %v777_v42 = vpop.permute.xlu0 %776 }
  0xf0   : > { %v814_v22 = vsel %vm546_vm2, %v804_v62, %v777_v42  ;;  %v532_v46 = vsel %vm525_vm1, %v3023_v35, %v416_v20  ;;  %v422_v62 = vpop.permute.xlu2 %421 }
  0xf1   : > { %v846_v48 = vrot.slane %v814_v22, 1  ;;  %2531 = vmatmul.msk.f32.gmra.mxu2 %vm569_vm3, %v1074_v38  ;;  %2488 = vmatmul.msk.f32.gmra.mxu0 %vm569_vm3, %v552_v44  ;;  %v1079_v38 = vsel %vm1066_vm5, %v1077_v21, %v1078_v61  ;;  %v1080_v1 = vrot.slane %v814_v22, 2  ;;  %v535_v13 = vsel %vm525_vm1, %v3042_v40, %v422_v62 }
  0xf3   : > { %v847_v52 = vsel %vm832_vm4, %v844_v25, %v846_v48 }
  0xf4   : > { %2511 = vmatmul.msk.f32.gmra.mxu1 %vm569_vm3, %v847_v52 }
  0xf7   : > { %v480_v26 = vpop.permute.xlu1 %479  ;;  %v478_v29 = vpop.permute.xlu0 %477 }
  0xf8   : > { %v554_v17 = vsel %vm546_vm2, %v533_v60, %v480_v26  ;;  %v553_v39 = vsel %vm546_vm2, %v532_v46, %v478_v29  ;;  %v750_v29 = vpop.permute.xlu2 %749 }
  0xf9   : > { %v849_v19 = vrot.slane %v554_v17, 1  ;;  %v848_v25 = vrot.slane %v553_v39, 1  ;;  %2532 = vmatmul.msk.f32.gmra.mxu2 %vm569_vm3, %v1076_v4  ;;  %2489 = vmatmul.msk.f32.gmra.mxu0 %vm569_vm3, %v553_v39  ;;  %v1081_v4 = vsel %vm1066_vm5, %v1078_v61, %v1080_v1  ;;  %v1082_v21 = vrot.slane %v553_v39, 2 }
  0xfb   : > { %v850_v36 = vsel %vm832_vm4, %v848_v25, %v849_v19 }
  0xfc   : > { %2512 = vmatmul.msk.f32.gmra.mxu1 %vm569_vm3, %v850_v36  ;;  %v1083_v36 = vrot.slane %v554_v17, 2 }
  0xfe   : > { %v1084_v61 = vsel %vm1066_vm5, %v1082_v21, %v1083_v36 }
  0xff   : > { %v420_v20 = vpop.permute.xlu1 %419  ;;  %v779_v42 = vpop.permute.xlu0 %778 }
 0x100   : > { %v815_v18 = vsel %vm546_vm2, %v805_v32, %v779_v42  ;;  %v534_v52 = vsel %vm525_vm1, %v3044_v41, %v420_v20  ;;  %v806_v32 = vsel %vm525_vm1, %v3053_v43, %v750_v29 }
 0x101   : > { %v851_v48 = vrot.slane %v815_v18, 1  ;;  %2533 = vmatmul.msk.f32.gmra.mxu2 %vm569_vm3, %v1079_v38  ;;  %2490 = vmatmul.msk.f32.gmra.mxu0 %vm569_vm3, %v554_v17  ;;  %v1085_v39 = vrot.slane %v815_v18, 2 }
 0x103   : > { %v852_v44 = vsel %vm832_vm4, %v849_v19, %v851_v48  ;;  %v426_v48 = vpop.permute.xlu2 %425  ;;  %v1086_v29 = vsel %vm1066_vm5, %v1083_v36, %v1085_v39 }
 0x104   : > { %2513 = vmatmul.msk.f32.gmra.mxu1 %vm569_vm3, %v852_v44  ;;  %v537_v1 = vsel %vm525_vm1, %v3071_v49, %v426_v48 }
 0x107   : > { %v484_v7 = vpop.permute.xlu1 %483  ;;  %v482_v46 = vpop.permute.xlu0 %481 }
 0x108   : > { %v556_v60 = vsel %vm546_vm2, %v535_v13, %v484_v7  ;;  %v555_v26 = vsel %vm546_vm2, %v534_v52, %v482_v46 }
 0x109   : > { %v854_v25 = vrot.slane %v556_v60, 1  ;;  %v853_v19 = vrot.slane %v555_v26, 1  ;;  %2534 = vmatmul.msk.f32.gmra.mxu2 %vm569_vm3, %v1081_v4  ;;  %2491 = vmatmul.msk.f32.gmra.mxu0 %vm569_vm3, %v555_v26 }
 0x10b   : > { %v855_v22 = vsel %vm832_vm4, %v853_v19, %v854_v25  ;;  %v752_v21 = vpop.permute.xlu2 %751 }
 0x10c   : > { %2514 = vmatmul.msk.f32.gmra.mxu1 %vm569_vm3, %v855_v22  ;;  %v1087_v22 = vrot.slane %v555_v26, 2 }
 0x10f   : > { %v424_v62 = vpop.permute.xlu1 %423  ;;  %v781_v20 = vpop.permute.xlu0 %780 }
 0x110   : > { %v816_v42 = vsel %vm546_vm2, %v806_v32, %v781_v20  ;;  %v536_v44 = vsel %vm525_vm1, %v3073_v50, %v424_v62  ;;  %v807_v32 = vsel %vm525_vm1, %v3086_v54, %v752_v21 }
 0x111   : > { %v856_v38 = vrot.slane %v816_v42, 1  ;;  %2535 = vmatmul.msk.f32.gmra.mxu2 %vm569_vm3, %v1084_v61  ;;  %2492 = vmatmul.msk.f32.gmra.mxu0 %vm569_vm3, %v556_v60 }
 0x113   : > { %v857_v17 = vsel %vm832_vm4, %v854_v25, %v856_v38  ;;  %v1088_v25 = vrot.slane %v556_v60, 2  ;;  %v1090_v60 = vrot.slane %v816_v42, 2 }
 0x114   : > { %2515 = vmatmul.msk.f32.gmra.mxu1 %vm569_vm3, %v857_v17 }
 0x115   : > { %v1089_v36 = vsel %vm1066_vm5, %v1087_v22, %v1088_v25  ;;  %v1091_v17 = vsel %vm1066_vm5, %v1088_v25, %v1090_v60 }
 0x117   : > { %v488_v52 = vpop.permute.xlu1 %487  ;;  %v486_v13 = vpop.permute.xlu0 %485 }
 0x118   : > { %v558_v7 = vsel %vm546_vm2, %v537_v1, %v488_v52  ;;  %v557_v46 = vsel %vm546_vm2, %v536_v44, %v486_v13  ;;  %v785_v44 = vpop.permute.xlu2 %784 }
 0x119   : > { %v859_v4 = vrot.slane %v558_v7, 1  ;;  %v858_v19 = vrot.slane %v557_v46, 1  ;;  %2536 = vmatmul.msk.f32.gmra.mxu2 %vm569_vm3, %v1086_v29  ;;  %2493 = vmatmul.msk.f32.gmra.mxu0 %vm569_vm3, %v557_v46  ;;  %v1093_v1 = vrot.slane %v558_v7, 2  ;;  %v1092_v52 = vrot.slane %v557_v46, 2 }
 0x11b   : > { %v860_v18 = vsel %vm832_vm4, %v858_v19, %v859_v4 }
 0x11c   : > { %2516 = vmatmul.msk.f32.gmra.mxu1 %vm569_vm3, %v860_v18 }
 0x11f   : > { %v783_v62 = vpop.permute.xlu0 %782  ;;  %v754_v48 = vpop.permute.xlu1 %753 }
 0x120   : > { %v817_v20 = vsel %vm546_vm2, %v807_v32, %v783_v62  ;;  %v808_v39 = vsel %vm525_vm1, %v3107_v63, %v754_v48 }
 0x121   : > { %v861_v61 = vrot.slane %v817_v20, 1  ;;  %2537 = vmatmul.msk.f32.gmra.mxu2 %vm569_vm3, %v1089_v36  ;;  %2494 = vmatmul.msk.f32.gmra.mxu0 %vm569_vm3, %v558_v7  ;;  %v818_v13 = vsel %vm546_vm2, %v808_v39, %v785_v44  ;;  %v1095_v18 = vrot.slane %v817_v20, 2 }
 0x122   : > { %v866_v42 = vrot.slane %v818_v13, 1  ;;  %v1100_v20 = vrot.slane %v818_v13, 2 }
 0x123   : > { %v862_v38 = vsel %vm832_vm4, %v859_v4, %v861_v61  ;;  %v1094_v4 = vsel %vm1066_vm5, %v1092_v52, %v1093_v1 }
 0x124   : > { %v687_v26 = vpop.f32.mrf.mxu2  ;;  %2517 = vmatmul.msk.f32.gmra.mxu1 %vm569_vm3, %v862_v38  ;;  %v867_v19 = vsel %vm832_vm4, %v864_v15, %v866_v42  ;;  %v1101_v38 = vsel %vm1066_vm5, %v1098_v16, %v1100_v20  ;;  %v4200_v20 = vrot.slane %v3220_v0, 1 }
 0x125   : > { %723 = vst.msk [vmem:[#allocation2 + $0x60] sm:$0xff] %vm546_vm2, %v687_v26 }
 0x127   : > { %v756_v46 = vpop.permute.xlu0 %755  ;;  %v787_v25 = vpop.permute.xlu1 %786 }
 0x128   : > { %v809_v22 = vsel %vm525_vm1, %v3158_v45, %v756_v46 }
 0x129   : > { %2538 = vmatmul.msk.f32.gmra.mxu2 %vm569_vm3, %v1091_v17  ;;  %v819_v21 = vsel %vm546_vm2, %v809_v22, %v787_v25 }
 0x12a   : > { %v871_v15 = vrot.slane %v819_v21, 1  ;;  %v1105_v13 = vrot.slane %v819_v21, 2 }
 0x12c   : > { %v690_v29 = vpop.f32.mrf.mxu2  ;;  %2518 = vmatmul.msk.f32.gmra.mxu1 %vm569_vm3, %v3136_v23  ;;  %v1096_v23 = vsel %vm1066_vm5, %v1093_v1, %v1095_v18  ;;  %v872_v62 = vsel %vm832_vm4, %v869_v51, %v871_v15  ;;  %v4198_v1 = vrot.slane %v3199_v14, 1  ;;  %v4199_v18 = vrot.slane %v3162_v47, 2 }
 0x12d   : > { %724 = vst.msk [vmem:[#allocation2 + $0x68] sm:$0xff] %vm546_vm2, %v690_v29 }
 0x12f   : > { %v789_v60 = vpop.permute.xlu0 %788  ;;  %v760_v29 = vpop.permute.xlu1 %759 }
 0x131   : > { %2539 = vmatmul.msk.f32.gmra.mxu2 %vm569_vm3, %v1094_v4 }
 0x134   : > { %v693_v7 = vpop.f32.mrf.mxu2  ;;  %2519 = vmatmul.msk.f32.gmra.mxu1 %vm569_vm3, %v867_v19 }
 0x135   : > { %725 = vst.msk [vmem:[#allocation2 + $0x70] sm:$0xff] %vm546_vm2, %v693_v7  ;;  %v811_v7 = vsel %vm525_vm1, %v3195_v57, %v760_v29 }
 0x139   : > { %2540 = vmatmul.msk.f32.gmra.mxu2 %vm569_vm3, %v1096_v23 }
 0x13c   : > { %v696_v32 = vpop.f32.mrf.mxu2  ;;  %2520 = vmatmul.msk.f32.gmra.mxu1 %vm569_vm3, %v3175_v55  ;;  %v758_v55 = vpop.permute.xlu2 %757 }
 0x13d   : > { %726 = vst.msk [vmem:[#allocation2 + $0x78] sm:$0xff] %vm546_vm2, %v696_v32 }
 0x141   : > { %2541 = vmatmul.msk.f32.gmra.mxu2 %vm569_vm3, %v3141_v24  ;;  %v810_v24 = vsel %vm525_vm1, %v3170_v53, %v758_v55 }
 0x142   : > { %v820_v51 = vsel %vm546_vm2, %v810_v24, %v789_v60 }
 0x143   : > { %v876_v12 = vrot.slane %v820_v51, 1 }
 0x144   : > { %v699_v36 = vpop.f32.mrf.mxu2  ;;  %2521 = vmatmul.msk.f32.gmra.mxu1 %vm569_vm3, %v872_v62  ;;  %v791_v46 = vpop.permute.xlu2 %790 }
 0x145   : > { %727 = vst.msk [vmem:[#allocation2 + $0x80] sm:$0xff] %vm546_vm2, %v699_v36  ;;  %v877_v52 = vsel %vm832_vm4, %v4198_v1, %v876_v12  ;;  %v821_v25 = vsel %vm546_vm2, %v811_v7, %v791_v46 }
 0x146   : > { %v651_v61 = vpop.f32.mrf.mxu0  ;;  %v881_v32 = vrot.slane %v821_v25, 1 }
 0x147   : > { %711 = vst.msk [vmem:[#allocation2] sm:$0xff] %vm546_vm2, %v651_v61  ;;  %v1110_v61 = vrot.slane %v820_v51, 2  ;;  %v3444_v51 = vld [vmem:[%s4159_s2] ss:$0 sm:$0xff] }
 0x148   : > { %v882_v36 = vsel %vm832_vm4, %v4200_v20, %v881_v32 }
 0x149   : > { %v946_v26 = vpop.f32.mrf.mxu1  ;;  %2542 = vmatmul.msk.f32.gmra.mxu2 %vm569_vm3, %v1101_v38 }
 0x14c   : > { %v702_v48 = vpop.f32.mrf.mxu2  ;;  %2522 = vmatmul.msk.f32.gmra.mxu1 %vm569_vm3, %v3208_v30 }
 0x14d   : > { %728 = vst.msk [vmem:[#allocation2 + $0x88] sm:$0xff] %vm546_vm2, %v702_v48  ;;  %v4201_v48 = vrot.slane %v3199_v14, 2 }
 0x14e   : > { %v1006_v17 = vld [vmem:[#allocation2] sm:$0xff]  ;;  %v654_v39 = vpop.f32.mrf.mxu0 }
 0x14f   : > { %v1026_v44 = vadd.f32 %v1006_v17, %v946_v26  ;;  %712 = vst.msk [vmem:[#allocation2 + $0x8] sm:$0xff] %vm546_vm2, %v654_v39  ;;  %v1111_v17 = vsel %vm1066_vm5, %v4201_v48, %v1110_v61 }
 0x151   : > { %1046 = vst.msk [vmem:[#allocation2] sm:$0xff] %vm546_vm2, %v1026_v44  ;;  %v949_v16 = vpop.f32.mrf.mxu1  ;;  %2543 = vmatmul.msk.f32.gmra.mxu2 %vm569_vm3, %v3180_v56  ;;  %v1106_v56 = vsel %vm1066_vm5, %v4199_v18, %v1105_v13 }
 0x154   : > { %v705_v30 = vpop.f32.mrf.mxu2  ;;  %2523 = vmatmul.msk.f32.gmra.mxu1 %vm569_vm3, %v877_v52 }
 0x155   : > { %729 = vst.msk [vmem:[#allocation2 + $0x90] sm:$0xff] %vm546_vm2, %v705_v30 }
 0x156   : > { %v1007_v42 = vld [vmem:[#allocation2 + $0x8] sm:$0xff]  ;;  %v657_v4 = vpop.f32.mrf.mxu0 }
 0x157   : > { %v1027_v19 = vadd.f32 %v1007_v42, %v949_v16  ;;  %713 = vst.msk [vmem:[#allocation2 + $0x10] sm:$0xff] %vm546_vm2, %v657_v4  ;;  %v1115_v42 = vrot.slane %v821_v25, 2 }
 0x158   : > { %v1240_v55 = vld [vmem:[#allocation2] sm:$0xff] }
 0x159   : > { %1047 = vst.msk [vmem:[#allocation2 + $0x8] sm:$0xff] %vm546_vm2, %v1027_v19  ;;  %v952_v23 = vpop.f32.mrf.mxu1  ;;  %2544 = vmatmul.msk.f32.gmra.mxu2 %vm569_vm3, %v1106_v56 }
 0x15c   : > { %v708_v22 = vpop.f32.mrf.mxu2  ;;  %2524 = vmatmul.msk.f32.gmra.mxu1 %vm569_vm3, %v3236_v6 }
 0x15d   : > { %730 = vst.msk [vmem:[#allocation2 + $0x98] sm:$0xff] %vm546_vm2, %v708_v22 }
 0x15e   : > { %v1008_v47 = vld [vmem:[#allocation2 + $0x10] sm:$0xff]  ;;  %v660_v21 = vpop.f32.mrf.mxu0 }
 0x15f   : > { %v1028_v15 = vadd.f32 %v1008_v47, %v952_v23  ;;  %714 = vst.msk [vmem:[#allocation2 + $0x18] sm:$0xff] %vm546_vm2, %v660_v21  ;;  %v4202_v47 = vrot.slane %v3220_v0, 2 }
 0x160   : > { %v1241_v12 = vld [vmem:[#allocation2 + $0x8] sm:$0xff] }
 0x161   : > { %1048 = vst.msk [vmem:[#allocation2 + $0x10] sm:$0xff] %vm546_vm2, %v1028_v15  ;;  %v955_v62 = vpop.f32.mrf.mxu1  ;;  %2545 = vmatmul.msk.f32.gmra.mxu2 %vm569_vm3, %v3213_v33 }
 0x164   : > { %2525 = vmatmul.msk.f32.gmra.mxu1 %vm569_vm3, %v882_v36  ;;  %v1180_v6 = vpop.f32.mrf.mxu2 }
 0x165   : > { %v1260_v38 = vadd.f32 %v1240_v55, %v1180_v6 }
 0x166   : > { %v1009_v24 = vld [vmem:[#allocation2 + $0x18] sm:$0xff]  ;;  %v663_v60 = vpop.f32.mrf.mxu0 }
 0x167   : > { %v1029_v26 = vadd.f32 %v1009_v24, %v955_v62  ;;  %1280 = vst.msk [vmem:[#allocation2] sm:$0xff] %vm546_vm2, %v1260_v38 }
 0x168   : > { %715 = vst.msk [vmem:[#allocation2 + $0x20] sm:$0xff] %vm546_vm2, %v663_v60  ;;  %v1242_v19 = vld [vmem:[#allocation2 + $0x10] sm:$0xff] }
 0x169   : > { %1049 = vst.msk [vmem:[#allocation2 + $0x18] sm:$0xff] %vm546_vm2, %v1029_v26  ;;  %v958_v33 = vpop.f32.mrf.mxu1  ;;  %2546 = vmatmul.msk.f32.gmra.mxu2 %vm569_vm3, %v1111_v17 }
 0x16c   : > { %v1183_v39 = vpop.f32.mrf.mxu2 }
 0x16d   : > { %v1261_v44 = vadd.f32 %v1241_v12, %v1183_v39 }
 0x16e   : > { %v1300_v16 = vld [vmem:[#allocation2] sm:$0xff]  ;;  %v666_v1 = vpop.f32.mrf.mxu0 }
 0x16f   : > { %v1324_v14 = vadd.f32 %v3444_v51, %v1300_v16  ;;  %v1010_v52 = vld [vmem:[#allocation2 + $0x20] sm:$0xff]  ;;  %1281 = vst.msk [vmem:[#allocation2 + $0x8] sm:$0xff] %vm546_vm2, %v1261_v44 }
 0x170   : > { %v1030_v13 = vadd.f32 %v1010_v52, %v958_v33  ;;  %716 = vst.msk [vmem:[#allocation2 + $0x28] sm:$0xff] %vm546_vm2, %v666_v1  ;;  %v1243_v15 = vld [vmem:[#allocation2 + $0x18] sm:$0xff] }
 0x171   : > { %v1344_v30 = vmax.f32 %v1324_v14, 0.0  ;;  %v961_v29 = vpop.f32.mrf.mxu1  ;;  %2547 = vmatmul.msk.f32.gmra.mxu2 %vm569_vm3, %v3241_v10  ;;  %v1116_v10 = vsel %vm1066_vm5, %v4202_v47, %v1115_v42 }
 0x172   : > { %1050 = vst.msk [vmem:[#allocation2 + $0x20] sm:$0xff] %vm546_vm2, %v1030_v13 }
 0x173   : > { %1364 = vst.msk [vmem:[#allocation4 + $0x1] sm:$0xff] %vm546_vm2, %v1344_v30 }
 0x174   : > { %v1186_v4 = vpop.f32.mrf.mxu2 }
 0x175   : > { %v1262_v18 = vadd.f32 %v1242_v19, %v1186_v4 }
 0x176   : > { %v1301_v56 = vld [vmem:[#allocation2 + $0x8] sm:$0xff]  ;;  %v669_v7 = vpop.f32.mrf.mxu0 }
 0x177   : > { %v1325_v46 = vadd.f32 %v3444_v51, %v1301_v56  ;;  %v1011_v23 = vld [vmem:[#allocation2 + $0x28] sm:$0xff]  ;;  %1282 = vst.msk [vmem:[#allocation2 + $0x10] sm:$0xff] %vm546_vm2, %v1262_v18 }
 0x178   : > { %v1031_v22 = vadd.f32 %v1011_v23, %v961_v29  ;;  %717 = vst.msk [vmem:[#allocation2 + $0x30] sm:$0xff] %vm546_vm2, %v669_v7 }
 0x179   : > { %v1345_v21 = vmax.f32 %v1325_v46, 0.0  ;;  %v964_v32 = vpop.f32.mrf.mxu1  ;;  %2548 = vmatmul.msk.f32.gmra.mxu2 %vm569_vm3, %v1116_v10  ;;  %v1244_v60 = vld [vmem:[#allocation2 + $0x20] sm:$0xff] }
 0x17a   : > { %1051 = vst.msk [vmem:[#allocation2 + $0x28] sm:$0xff] %vm546_vm2, %v1031_v22 }
 0x17b   : > { %1365 = vst.msk [vmem:[#allocation4 + $0x9] sm:$0xff] %vm546_vm2, %v1345_v21 }
 0x17c   : > { %v1189_v25 = vpop.f32.mrf.mxu2 }
 0x17d   : > { %v1263_v62 = vadd.f32 %v1243_v15, %v1189_v25 }
 0x17e   : > { %v1302_v20 = vld [vmem:[#allocation2 + $0x10] sm:$0xff]  ;;  %v672_v36 = vpop.f32.mrf.mxu0 }
 0x17f   : > { %v1326_v61 = vadd.f32 %v3444_v51, %v1302_v20  ;;  %v1012_v0 = vld [vmem:[#allocation2 + $0x30] sm:$0xff]  ;;  %1283 = vst.msk [vmem:[#allocation2 + $0x18] sm:$0xff] %vm546_vm2, %v1263_v62 }
 0x180   : > { %v1032_v6 = vadd.f32 %v1012_v0, %v964_v32  ;;  %718 = vst.msk [vmem:[#allocation2 + $0x38] sm:$0xff] %vm546_vm2, %v672_v36 }
 0x181   : > { %v1346_v55 = vmax.f32 %v1326_v61, 0.0  ;;  %v967_v38 = vpop.f32.mrf.mxu1  ;;  %v1245_v14 = vld [vmem:[#allocation2 + $0x28] sm:$0xff] }
 0x182   : > { %1052 = vst.msk [vmem:[#allocation2 + $0x30] sm:$0xff] %vm546_vm2, %v1032_v6 }
 0x183   : > { %1366 = vst.msk [vmem:[#allocation4 + $0x19] sm:$0xff] %vm546_vm2, %v1346_v55 }
 0x184   : > { %v1192_v24 = vpop.f32.mrf.mxu2 }
 0x185   : > { %v1264_v26 = vadd.f32 %v1244_v60, %v1192_v24 }
 0x186   : > { %v1303_v48 = vld [vmem:[#allocation2 + $0x18] sm:$0xff]  ;;  %v675_v17 = vpop.f32.mrf.mxu0 }
 0x187   : > { %v1327_v33 = vadd.f32 %v3444_v51, %v1303_v48  ;;  %v1013_v39 = vld [vmem:[#allocation2 + $0x38] sm:$0xff]  ;;  %1284 = vst.msk [vmem:[#allocation2 + $0x20] sm:$0xff] %vm546_vm2, %v1264_v26 }
 0x188   : > { %v1033_v12 = vadd.f32 %v1013_v39, %v967_v38  ;;  %719 = vst.msk [vmem:[#allocation2 + $0x40] sm:$0xff] %vm546_vm2, %v675_v17 }
 0x189   : > { %v1347_v44 = vmax.f32 %v1327_v33, 0.0  ;;  %v970_v16 = vpop.f32.mrf.mxu1  ;;  %v1246_v7 = vld [vmem:[#allocation2 + $0x30] sm:$0xff] }
 0x18a   : > { %1053 = vst.msk [vmem:[#allocation2 + $0x38] sm:$0xff] %vm546_vm2, %v1033_v12 }
 0x18b   : > { %1367 = vst.msk [vmem:[#allocation4 + $0x21] sm:$0xff] %vm546_vm2, %v1347_v44 }
 0x18c   : > { %v1195_v1 = vpop.f32.mrf.mxu2 }
 0x18d   : > { %v1265_v52 = vadd.f32 %v1245_v14, %v1195_v1  ;;  %v1018_v1 = vld [vmem:[#allocation2 + $0x60] sm:$0xff] }
 0x18e   : > { %v1304_v13 = vld [vmem:[#allocation2 + $0x20] sm:$0xff]  ;;  %v678_v30 = vpop.f32.mrf.mxu0 }
 0x18f   : > { %v1328_v29 = vadd.f32 %v3444_v51, %v1304_v13  ;;  %v1014_v42 = vld [vmem:[#allocation2 + $0x40] sm:$0xff]  ;;  %1285 = vst.msk [vmem:[#allocation2 + $0x28] sm:$0xff] %vm546_vm2, %v1265_v52 }
 0x190   : > { %v1034_v4 = vadd.f32 %v1014_v42, %v970_v16  ;;  %720 = vst.msk [vmem:[#allocation2 + $0x48] sm:$0xff] %vm546_vm2, %v678_v30 }
 0x191   : > { %v1348_v19 = vmax.f32 %v1328_v29, 0.0  ;;  %v973_v18 = vpop.f32.mrf.mxu1  ;;  %v1247_v62 = vld [vmem:[#allocation2 + $0x38] sm:$0xff] }
 0x192   : > { %1054 = vst.msk [vmem:[#allocation2 + $0x40] sm:$0xff] %vm546_vm2, %v1034_v4 }
 0x193   : > { %1368 = vst.msk [vmem:[#allocation4 + $0x31] sm:$0xff] %vm546_vm2, %v1348_v19 }
 0x194   : > { %v1198_v56 = vpop.f32.mrf.mxu2 }
 0x195   : > { %v1266_v46 = vadd.f32 %v1246_v7, %v1198_v56 }
 0x196   : > { %v1305_v23 = vld [vmem:[#allocation2 + $0x28] sm:$0xff]  ;;  %v681_v22 = vpop.f32.mrf.mxu0 }
 0x197   : > { %v1329_v47 = vadd.f32 %v3444_v51, %v1305_v23  ;;  %v1015_v10 = vld [vmem:[#allocation2 + $0x48] sm:$0xff]  ;;  %1286 = vst.msk [vmem:[#allocation2 + $0x30] sm:$0xff] %vm546_vm2, %v1266_v46 }
 0x198   : > { %v1035_v21 = vadd.f32 %v1015_v10, %v973_v18  ;;  %721 = vst.msk [vmem:[#allocation2 + $0x50] sm:$0xff] %vm546_vm2, %v681_v22  ;;  %v1019_v18 = vld [vmem:[#allocation2 + $0x68] sm:$0xff] }
 0x199   : > { %v1349_v32 = vmax.f32 %v1329_v47, 0.0  ;;  %v976_v25 = vpop.f32.mrf.mxu1  ;;  %v1248_v26 = vld [vmem:[#allocation2 + $0x40] sm:$0xff] }
 0x19a   : > { %1055 = vst.msk [vmem:[#allocation2 + $0x48] sm:$0xff] %vm546_vm2, %v1035_v21 }
 0x19b   : > { %1369 = vst.msk [vmem:[#allocation4 + $0x39] sm:$0xff] %vm546_vm2, %v1349_v32  ;;  %v1020_v32 = vld [vmem:[#allocation2 + $0x70] sm:$0xff] }
 0x19c   : > { %v1201_v15 = vpop.f32.mrf.mxu2 }
 0x19d   : > { %v1267_v20 = vadd.f32 %v1247_v62, %v1201_v15 }
 0x19e   : > { %v1306_v36 = vld [vmem:[#allocation2 + $0x30] sm:$0xff]  ;;  %v684_v61 = vpop.f32.mrf.mxu0 }
 0x19f   : > { %v1330_v0 = vadd.f32 %v3444_v51, %v1306_v36  ;;  %v1016_v6 = vld [vmem:[#allocation2 + $0x50] sm:$0xff]  ;;  %1287 = vst.msk [vmem:[#allocation2 + $0x38] sm:$0xff] %vm546_vm2, %v1267_v20 }
 0x1a0   : > { %v1036_v55 = vadd.f32 %v1016_v6, %v976_v25  ;;  %722 = vst.msk [vmem:[#allocation2 + $0x58] sm:$0xff] %vm546_vm2, %v684_v61 }
 0x1a1   : > { %v1350_v38 = vmax.f32 %v1330_v0, 0.0  ;;  %v979_v24 = vpop.f32.mrf.mxu1  ;;  %v1249_v13 = vld [vmem:[#allocation2 + $0x48] sm:$0xff] }
 0x1a2   : > { %1056 = vst.msk [vmem:[#allocation2 + $0x50] sm:$0xff] %vm546_vm2, %v1036_v55  ;;  %v1021_v55 = vld [vmem:[#allocation2 + $0x78] sm:$0xff] }
 0x1a3   : > { %1370 = vst.msk [vmem:[#allocation4 + $0x49] sm:$0xff] %vm546_vm2, %v1350_v38 }
 0x1a4   : > { %v1204_v60 = vpop.f32.mrf.mxu2 }
 0x1a5   : > { %v1268_v48 = vadd.f32 %v1248_v26, %v1204_v60 }
 0x1a6   : > { %v1307_v17 = vld [vmem:[#allocation2 + $0x38] sm:$0xff] }
 0x1a7   : > { %v1331_v33 = vadd.f32 %v3444_v51, %v1307_v17  ;;  %v1017_v39 = vld [vmem:[#allocation2 + $0x58] sm:$0xff]  ;;  %1288 = vst.msk [vmem:[#allocation2 + $0x40] sm:$0xff] %vm546_vm2, %v1268_v48 }
 0x1a8   : > { %v1037_v12 = vadd.f32 %v1017_v39, %v979_v24 }
 0x1a9   : > { %v1351_v44 = vmax.f32 %v1331_v33, 0.0  ;;  %v982_v16 = vpop.f32.mrf.mxu1  ;;  %v1250_v46 = vld [vmem:[#allocation2 + $0x50] sm:$0xff] }
 0x1aa   : > { %1057 = vst.msk [vmem:[#allocation2 + $0x58] sm:$0xff] %vm546_vm2, %v1037_v12  ;;  %v1038_v14 = vadd.f32 %v1018_v1, %v982_v16  ;;  %v1022_v12 = vld [vmem:[#allocation2 + $0x80] sm:$0xff] }
 0x1ab   : > { %1371 = vst.msk [vmem:[#allocation4 + $0x51] sm:$0xff] %vm546_vm2, %v1351_v44 }
 0x1ac   : > { %1058 = vst.msk [vmem:[#allocation2 + $0x60] sm:$0xff] %vm546_vm2, %v1038_v14  ;;  %v1207_v52 = vpop.f32.mrf.mxu2 }
 0x1ad   : > { %v1269_v30 = vadd.f32 %v1249_v13, %v1207_v52 }
 0x1ae   : > { %v1308_v29 = vld [vmem:[#allocation2 + $0x40] sm:$0xff] }
 0x1af   : > { %v1332_v42 = vadd.f32 %v3444_v51, %v1308_v29  ;;  %1289 = vst.msk [vmem:[#allocation2 + $0x48] sm:$0xff] %vm546_vm2, %v1269_v30 }
 0x1b1   : > { %v1352_v4 = vmax.f32 %v1332_v42, 0.0  ;;  %v985_v19 = vpop.f32.mrf.mxu1  ;;  %v1251_v62 = vld [vmem:[#allocation2 + $0x58] sm:$0xff]  ;;  %v1023_v42 = vld [vmem:[#allocation2 + $0x88] sm:$0xff] }
 0x1b2   : > { %v1039_v56 = vadd.f32 %v1019_v18, %v985_v19 }
 0x1b3   : > { %1372 = vst.msk [vmem:[#allocation4 + $0x61] sm:$0xff] %vm546_vm2, %v1352_v4  ;;  %v1252_v60 = vld [vmem:[#allocation2 + $0x60] sm:$0xff] }
 0x1b4   : > { %1059 = vst.msk [vmem:[#allocation2 + $0x68] sm:$0xff] %vm546_vm2, %v1039_v56  ;;  %v1210_v7 = vpop.f32.mrf.mxu2 }
 0x1b5   : > { %v1270_v23 = vadd.f32 %v1250_v46, %v1210_v7 }
 0x1b6   : > { %v1309_v22 = vld [vmem:[#allocation2 + $0x48] sm:$0xff] }
 0x1b7   : > { %v1333_v47 = vadd.f32 %v3444_v51, %v1309_v22  ;;  %1290 = vst.msk [vmem:[#allocation2 + $0x50] sm:$0xff] %vm546_vm2, %v1270_v23 }
 0x1b9   : > { %v1353_v10 = vmax.f32 %v1333_v47, 0.0  ;;  %v988_v21 = vpop.f32.mrf.mxu1  ;;  %v1024_v47 = vld [vmem:[#allocation2 + $0x90] sm:$0xff] }
 0x1ba   : > { %v1040_v25 = vadd.f32 %v1020_v32, %v988_v21 }
 0x1bb   : > { %1373 = vst.msk [vmem:[#allocation4 + $0x69] sm:$0xff] %vm546_vm2, %v1353_v10  ;;  %v1253_v1 = vld [vmem:[#allocation2 + $0x68] sm:$0xff] }
 0x1bc   : > { %1060 = vst.msk [vmem:[#allocation2 + $0x70] sm:$0xff] %vm546_vm2, %v1040_v25  ;;  %v1213_v15 = vpop.f32.mrf.mxu2 }
 0x1bd   : > { %v1271_v20 = vadd.f32 %v1251_v62, %v1213_v15 }
 0x1be   : > { %v1310_v36 = vld [vmem:[#allocation2 + $0x50] sm:$0xff] }
 0x1bf   : > { %v1334_v61 = vadd.f32 %v3444_v51, %v1310_v36  ;;  %1291 = vst.msk [vmem:[#allocation2 + $0x58] sm:$0xff] %vm546_vm2, %v1271_v20 }
 0x1c1   : > { %v1354_v0 = vmax.f32 %v1334_v61, 0.0  ;;  %v991_v6 = vpop.f32.mrf.mxu1  ;;  %v1025_v61 = vld [vmem:[#allocation2 + $0x98] sm:$0xff] }
 0x1c2   : > { %v1041_v38 = vadd.f32 %v1021_v55, %v991_v6 }
 0x1c3   : > { %1374 = vst.msk [vmem:[#allocation4 + $0x79] sm:$0xff] %vm546_vm2, %v1354_v0  ;;  %v1254_v18 = vld [vmem:[#allocation2 + $0x70] sm:$0xff] }
 0x1c4   : > { %1061 = vst.msk [vmem:[#allocation2 + $0x78] sm:$0xff] %vm546_vm2, %v1041_v38  ;;  %v1216_v24 = vpop.f32.mrf.mxu2 }
 0x1c5   : > { %v1272_v26 = vadd.f32 %v1252_v60, %v1216_v24 }
 0x1c6   : > { %v1311_v48 = vld [vmem:[#allocation2 + $0x58] sm:$0xff] }
 0x1c7   : > { %v1335_v17 = vadd.f32 %v3444_v51, %v1311_v48  ;;  %1292 = vst.msk [vmem:[#allocation2 + $0x60] sm:$0xff] %vm546_vm2, %v1272_v26 }
 0x1c9   : > { %v1355_v33 = vmax.f32 %v1335_v17, 0.0  ;;  %v994_v39 = vpop.f32.mrf.mxu1 }
 0x1ca   : > { %v1042_v44 = vadd.f32 %v1022_v12, %v994_v39 }
 0x1cb   : > { %1375 = vst.msk [vmem:[#allocation4 + $0x81] sm:$0xff] %vm546_vm2, %v1355_v33  ;;  %v1255_v32 = vld [vmem:[#allocation2 + $0x78] sm:$0xff]  ;;  %v2802_v33 = vmov 0.0  }
 0x1cc   : > { %1062 = vst.msk [vmem:[#allocation2 + $0x80] sm:$0xff] %vm546_vm2, %v1042_v44  ;;  %v1219_v16 = vpop.f32.mrf.mxu2 }
 0x1cd   : > { %v1273_v14 = vadd.f32 %v1253_v1, %v1219_v16  ;;  %1385 = vst.msk [vmem:[#allocation4] sm:$0x1] %vm1384_vm6, %v2802_v33 }
 0x1ce   : > { %v1312_v52 = vld [vmem:[#allocation2 + $0x60] sm:$0xff]  ;;  %1386 = vst.msk [vmem:[#allocation4 + $0x18] sm:$0x1] %vm1384_vm6, %v2802_v33 }
 0x1cf   : > { %v1336_v13 = vadd.f32 %v3444_v51, %v1312_v52  ;;  %1293 = vst.msk [vmem:[#allocation2 + $0x68] sm:$0xff] %vm546_vm2, %v1273_v14 }
 0x1d0   : > { %1387 = vst.msk [vmem:[#allocation4 + $0x30] sm:$0x1] %vm1384_vm6, %v2802_v33 }
 0x1d1   : > { %v1356_v30 = vmax.f32 %v1336_v13, 0.0  ;;  %v997_v29 = vpop.f32.mrf.mxu1  ;;  %1388 = vst.msk [vmem:[#allocation4 + $0x48] sm:$0x1] %vm1384_vm6, %v2802_v33 }
 0x1d2   : > { %v1043_v4 = vadd.f32 %v1023_v42, %v997_v29  ;;  %1389 = vst.msk [vmem:[#allocation4 + $0x60] sm:$0x1] %vm1384_vm6, %v2802_v33 }
 0x1d3   : > { %1376 = vst.msk [vmem:[#allocation4 + $0x91] sm:$0xff] %vm546_vm2, %v1356_v30  ;;  %v1256_v55 = vld [vmem:[#allocation2 + $0x80] sm:$0xff] }
 0x1d4   : > { %1063 = vst.msk [vmem:[#allocation2 + $0x88] sm:$0xff] %vm546_vm2, %v1043_v4  ;;  %v1222_v19 = vpop.f32.mrf.mxu2 }
 0x1d5   : > { %v1274_v56 = vadd.f32 %v1254_v18, %v1222_v19  ;;  %1390 = vst.msk [vmem:[#allocation4 + $0x78] sm:$0x1] %vm1384_vm6, %v2802_v33 }
 0x1d6   : > { %v1313_v7 = vld [vmem:[#allocation2 + $0x68] sm:$0xff]  ;;  %1391 = vst.msk [vmem:[#allocation4 + $0x90] sm:$0x1] %vm1384_vm6, %v2802_v33 }
 0x1d7   : > { %v1337_v46 = vadd.f32 %v3444_v51, %v1313_v7  ;;  %1294 = vst.msk [vmem:[#allocation2 + $0x70] sm:$0xff] %vm546_vm2, %v1274_v56 }
 0x1d8   : > { %1392 = vst.msk [vmem:[#allocation4 + $0xa8] sm:$0x1] %vm1384_vm6, %v2802_v33 }
 0x1d9   : > { %v1357_v23 = vmax.f32 %v1337_v46, 0.0  ;;  %v1000_v22 = vpop.f32.mrf.mxu1  ;;  %1393 = vst.msk [vmem:[#allocation4 + $0xc0] sm:$0x1] %vm1384_vm6, %v2802_v33 }
 0x1da   : > { %v1044_v10 = vadd.f32 %v1024_v47, %v1000_v22  ;;  %1394 = vst.msk [vmem:[#allocation4 + $0xd8] sm:$0x1] %vm1384_vm6, %v2802_v33 }
 0x1db   : > { %1377 = vst.msk [vmem:[#allocation4 + $0x99] sm:$0xff] %vm546_vm2, %v1357_v23  ;;  %v1257_v17 = vld [vmem:[#allocation2 + $0x88] sm:$0xff] }
 0x1dc   : > { %1064 = vst.msk [vmem:[#allocation2 + $0x90] sm:$0xff] %vm546_vm2, %v1044_v10  ;;  %v1225_v21 = vpop.f32.mrf.mxu2 }
 0x1dd   : > { %v1275_v25 = vadd.f32 %v1255_v32, %v1225_v21  ;;  %1395 = vst.msk [vmem:[#allocation4 + $0x11] sm:$0x1] %vm1384_vm6, %v2802_v33 }
 0x1de   : > { %v1314_v15 = vld [vmem:[#allocation2 + $0x70] sm:$0xff]  ;;  %1396 = vst.msk [vmem:[#allocation4 + $0x29] sm:$0x1] %vm1384_vm6, %v2802_v33 }
 0x1df   : > { %v1338_v62 = vadd.f32 %v3444_v51, %v1314_v15  ;;  %1295 = vst.msk [vmem:[#allocation2 + $0x78] sm:$0xff] %vm546_vm2, %v1275_v25 }
 0x1e0   : > { %1397 = vst.msk [vmem:[#allocation4 + $0x41] sm:$0x1] %vm1384_vm6, %v2802_v33 }
 0x1e1   : > { %v1358_v20 = vmax.f32 %v1338_v62, 0.0  ;;  %v1003_v36 = vpop.f32.mrf.mxu1  ;;  %1398 = vst.msk [vmem:[#allocation4 + $0x59] sm:$0x1] %vm1384_vm6, %v2802_v33 }
 0x1e2   : > { %v1045_v0 = vadd.f32 %v1025_v61, %v1003_v36  ;;  %1399 = vst.msk [vmem:[#allocation4 + $0x71] sm:$0x1] %vm1384_vm6, %v2802_v33 }
 0x1e3   : > { %1378 = vst.msk [vmem:[#allocation4 + $0xa9] sm:$0xff] %vm546_vm2, %v1358_v20  ;;  %v1258_v14 = vld [vmem:[#allocation2 + $0x90] sm:$0xff] }
 0x1e4   : > { %1065 = vst.msk [vmem:[#allocation2 + $0x98] sm:$0xff] %vm546_vm2, %v1045_v0  ;;  %v1228_v6 = vpop.f32.mrf.mxu2 }
 0x1e5   : > { %v1276_v38 = vadd.f32 %v1256_v55, %v1228_v6  ;;  %1400 = vst.msk [vmem:[#allocation4 + $0x89] sm:$0x1] %vm1384_vm6, %v2802_v33 }
 0x1e6   : > { %v1315_v24 = vld [vmem:[#allocation2 + $0x78] sm:$0xff]  ;;  %1401 = vst.msk [vmem:[#allocation4 + $0xa1] sm:$0x1] %vm1384_vm6, %v2802_v33 }
 0x1e7   : > { %v1339_v60 = vadd.f32 %v3444_v51, %v1315_v24  ;;  %1296 = vst.msk [vmem:[#allocation2 + $0x80] sm:$0xff] %vm546_vm2, %v1276_v38 }
 0x1e8   : > { %1402 = vst.msk [vmem:[#allocation4 + $0xb9] sm:$0x1] %vm1384_vm6, %v2802_v33 }
 0x1e9   : > { %v1359_v26 = vmax.f32 %v1339_v60, 0.0  ;;  %1403 = vst.msk [vmem:[#allocation4 + $0xd1] sm:$0x1] %vm1384_vm6, %v2802_v33 }
 0x1ea   : > { %1404 = vst.msk [vmem:[#allocation4 + $0xe9] sm:$0x1] %vm1384_vm6, %v2802_v33 }
 0x1eb   : > { %1379 = vst.msk [vmem:[#allocation4 + $0xb1] sm:$0xff] %vm546_vm2, %v1359_v26  ;;  %v1259_v4 = vld [vmem:[#allocation2 + $0x98] sm:$0xff] }
 0x1ec   : > { %v1231_v48 = vpop.f32.mrf.mxu2 }
 0x1ed   : > { %v1277_v39 = vadd.f32 %v1257_v17, %v1231_v48 }
 0x1ee   : > { %v1316_v12 = vld [vmem:[#allocation2 + $0x80] sm:$0xff] }
 0x1ef   : > { %v1340_v44 = vadd.f32 %v3444_v51, %v1316_v12  ;;  %1297 = vst.msk [vmem:[#allocation2 + $0x88] sm:$0xff] %vm546_vm2, %v1277_v39 }
 0x1f1   : > { %v1360_v16 = vmax.f32 %v1340_v44, 0.0 }
 0x1f3   : > { %1380 = vst.msk [vmem:[#allocation4 + $0xc1] sm:$0xff] %vm546_vm2, %v1360_v16 }
 0x1f4   : > { %v1234_v1 = vpop.f32.mrf.mxu2 }
 0x1f5   : > { %v1278_v52 = vadd.f32 %v1258_v14, %v1234_v1 }
 0x1f6   : > { %v1317_v13 = vld [vmem:[#allocation2 + $0x88] sm:$0xff] }
 0x1f7   : > { %v1341_v30 = vadd.f32 %v3444_v51, %v1317_v13  ;;  %1298 = vst.msk [vmem:[#allocation2 + $0x90] sm:$0xff] %vm546_vm2, %v1278_v52 }
 0x1f9   : > { %v1361_v29 = vmax.f32 %v1341_v30, 0.0 }
 0x1fb   : > { %1381 = vst.msk [vmem:[#allocation4 + $0xc9] sm:$0xff] %vm546_vm2, %v1361_v29 }
 0x1fc   : > { %v1237_v42 = vpop.f32.mrf.mxu2 }
 0x1fd   : > { %v1279_v19 = vadd.f32 %v1259_v4, %v1237_v42 }
 0x1fe   : > { %v1318_v18 = vld [vmem:[#allocation2 + $0x90] sm:$0xff] }
 0x1ff   : > { %v1342_v56 = vadd.f32 %v3444_v51, %v1318_v18  ;;  %1299 = vst.msk [vmem:[#allocation2 + $0x98] sm:$0xff] %vm546_vm2, %v1279_v19 }
 0x201   : > { %v1362_v7 = vmax.f32 %v1342_v56, 0.0 }
 0x203   : > { %1382 = vst.msk [vmem:[#allocation4 + $0xd9] sm:$0xff] %vm546_vm2, %v1362_v7 }
 0x206   : > { %v1319_v46 = vld [vmem:[#allocation2 + $0x98] sm:$0xff] }
 0x207   : > { %v1343_v23 = vadd.f32 %v3444_v51, %v1319_v46  ;;  %1408 = sbr.rel (%p2549_p0) target bundleno = 528 (0x210), region = 52 }
 0x209   : > { %v1363_v22 = vmax.f32 %v1343_v23, 0.0 }
 0x20b   : > { %1383 = vst.msk [vmem:[#allocation4 + $0xe1] sm:$0xff] %vm546_vm2, %v1363_v22 }
 0x20c   : > { %vm1411_vm7 = vcmask 58368   ;;  %v2803_v47 = vmov 0.0  }
 0x20d   : > { %1409 = vst.msk [vmem:[#allocation4] sm:$0xff] %vm546_vm2, %v2803_v47 }
 0x20e   : > { %1410 = vst.msk [vmem:[#allocation4 + $0x8] sm:$0xff] %vm546_vm2, %v2803_v47 }
 0x20f   : > { %1412 = vst.msk [vmem:[#allocation4 + $0x10] sm:$0x3] %vm1411_vm7, %v2803_v47 }
 0x210 PF: > { %p2550_p1 = scmp.ne.s32.totalorder %s2782_s27, 1 }
 0x212   : > { %1416 = sbr.rel (%p2550_p1) target bundleno = 539 (0x21b), region = 56 }
 0x217   : > { %vm1420_vm8 = vcmask 58368   ;;  %v2804_v51 = vmov 0.0  }
 0x218   : > { %1418 = vst.msk [vmem:[#allocation4 + $0xd8] sm:$0xff] %vm546_vm2, %v2804_v51 }
 0x219   : > { %1419 = vst.msk [vmem:[#allocation4 + $0xe0] sm:$0xff] %vm546_vm2, %v2804_v51 }
 0x21a   : > { %1421 = vst.msk [vmem:[#allocation4 + $0xe8] sm:$0x3] %vm1420_vm8, %v2804_v51 }
 0x21b PF: > { %v3563_v10 = vld [vmem:[#allocation4 + $0x50] sm:$0xff]  ;;  %v3565_v21 = vld [vmem:[#allocation4 + $0x48] sm:$0xff]  ;;  %v3571_v32 = vld [vmem:[#allocation4 + $0x60] sm:$0xff]  ;;  %s2805_s17 = smov 16   ;;  %vm1582_vm9 = vcmask 130048   ;;  %vm1602_vm10 = vcmask 195584  }
 0x21c   : > { %1478 = vrot.lane.b32.xlu1 %v3563_v10, %s2801_s11  ;;  %1476 = vrot.lane.b32.xlu0 %v3565_v21, %s2801_s11  ;;  %v3575_v25 = vld [vmem:[#allocation4 + $0x68] sm:$0xff]  ;;  %v3577_v15 = vld [vmem:[#allocation4 + $0x78] sm:$0xff]  ;;  %v3585_v62 = vld [vmem:[#allocation4 + $0x80] sm:$0xff]  ;;  %vm2278_vm11 = vcmask 31745   ;;  %vm2281_vm12 = vcmask 24576   ;;  %s2611_s13 = sshll.u32 %s2782_s27, 2 }
 0x21d   : > { %1480 = vrot.lane.b32.xlu2 %v3571_v32, %s2801_s11  ;;  %v3593_v20 = vld [vmem:[#allocation4 + $0x90] sm:$0xff]  ;;  %v3595_v36 = vld [vmem:[#allocation4 + $0x98] sm:$0xff]  ;;  %v3603_v61 = vld [vmem:[#allocation4 + $0xa8] sm:$0xff]  ;;  %s2612_s16 = sshll.u32 %s2786_s28, 3  ;;  %s2387_s27 = sshll.u32 %s3555_s9, 4  ;;  %s2388_s27 = int_to_ptr.vmem [resolvable:$true] %s2387_s27 }
 0x21e   : > { %v3611_v0 = vld [vmem:[#allocation4 + $0xb0] sm:$0xff]  ;;  %v1446_v6 = vld [vmem:[#allocation4 + $0xc0] sm:$0xff]  ;;  %v1447_v55 = vld [vmem:[#allocation4 + $0xc8] sm:$0xff]  ;;  %s2384_s10 = sadd.s32 %s2612_s16, %s2611_s13  ;;  %s2373_s22 = scalar_lea.sflag [#allocation8], %s296_s12 }
 0x21f   : > { %v1449_v38 = vld [vmem:[#allocation4 + $0xd8] sm:$0xff]  ;;  %v3625_v60 = vld [vmem:[#allocation4 + $0x20] sm:$0xff]  ;;  %v1428_v48 = vld [vmem:[#allocation4 + $0x30] sm:$0xff]  ;;  %s2613_s18 = sshll.u32 %s2384_s10, 3 }
 0x220   : > { %v1450_v24 = vld [vmem:[#allocation4 + $0xe0] sm:$0xff]  ;;  %v3627_v26 = vld [vmem:[#allocation4 + $0x18] sm:$0xff]  ;;  %v3634_v17 = vld [vmem:[#allocation4 + $0x28] sm:$0x3]  ;;  %s2386_s21 = scalar_lea.hbm %s4164_s7, %s2613_s18  ;;  %s2724_s18 = scalar_lea.hbm %s4164_s7, 128 }
 0x221   : > { %v1429_v33 = vld [vmem:[#allocation4 + $0x38] sm:$0xff]  ;;  %v3639_v39 = vld [vmem:[#allocation4 + $0x40] sm:$0x3]  ;;  %v1601_v12 = vld [vmem:[%s4160_s3 + $0x10] sm:$0xff]  ;;  %s2389_s28 = sshll.u32 %s2386_s21, 4  ;;  %s2390_s28 = int_to_ptr.hbm [resolvable:$true] %s2389_s28 }
 0x222   : > { %2618 = vmatpush.msra.mxu3 %v1601_v12  ;;  %1664 = vmatpush.msrb.mxu1 %v1601_v12  ;;  %v3654_v44 = vld [vmem:[#allocation4 + $0x58] sm:$0x3]  ;;  %v1600_v16 = vld [vmem:[%s4160_s3 + $0x8] sm:$0xff]  ;;  %v1599_v1 = vld [vmem:[%s4160_s3] sm:$0xff]  ;;  %s2718_s23 = sshra.s32 %s2390_s28, 4  ;;  %s2719_s23 = int_to_ptr.hbm [resolvable:$true] %s2718_s23 }
 0x223   : > { %v2569_v14 = vld [vmem:[%s4160_s3 + $0x28] sm:$0xff]  ;;  %v3667_v52 = vld [vmem:[#allocation4 + $0x70] sm:$0x3]  ;;  %v3681_v42 = vld [vmem:[#allocation4 + $0xa0] sm:$0x3]  ;;  %s2720_s13 = scalar_lea.hbm %s2719_s23, 32  ;;  %p2725_p6 = scmp.lt.s32.totalorder %s2719_s23, %s4164_s7 }
 0x224   : > { %1528 = vrot.lane.b32.xlu1 %v3575_v25, %s2805_s17  ;;  %1526 = vrot.lane.b32.xlu0 %v3571_v32, %s2805_s17  ;;  %v3675_v30 = vld [vmem:[#allocation4 + $0x88] sm:$0x3]  ;;  %v3685_v4 = vld [vmem:[#allocation4 + $0xb8] sm:$0x3]  ;;  %v1448_v7 = vld [vmem:[#allocation4 + $0xd0] sm:$0x3]  ;;  %p2721_p2 = scmp.ne.s32.totalorder %s2719_s23, %s2720_s13  ;;  %p2726_p7 = scmp.lt.s32.totalorder %s2724_s18, %s2720_s13 }
 0x225   : > { %1530 = vrot.lane.b32.xlu2 %v3577_v15, %s2805_s17  ;;  %2619 = vmatpush.msra.mxu3 %v1600_v16  ;;  %v1451_v46 = vld [vmem:[#allocation4 + $0xe8] sm:$0x3] }
 0x226   : > { %1665 = vmatpush.msrb.mxu1 %v1600_v16  ;;  %p2722_p4 = pnand %p2721_p2, %p2898_p3  ;;  %p2727_p9 = por %p2726_p7, %p2725_p6 }
 0x227   : > { %2620 = vmatpush.msra.mxu3 %v1599_v1 }
 0x228   : > { %1666 = vmatpush.msrb.mxu1 %v1599_v1  ;;  %p2723_p5 = pneg %p2722_p4 }
 0x229   : > { %1902 = vmatpush.msrb.mxu3 %v2569_v14 }
 0x22a   : > { %p2728_p10 = pnand %p2727_p9, %p2723_p5 }
 0x22c   : > { %1532 = vrot.lane.b32.xlu1 %v3585_v62, %s2805_s17  ;;  %1482 = vrot.lane.b32.xlu0 %v3575_v25, %s2801_s11 }
 0x22d   : > { %1484 = vrot.lane.b32.xlu2 %v3577_v15, %s2801_s11 }
 0x234   : > { %1486 = vrot.lane.b32.xlu1 %v3585_v62, %s2801_s11  ;;  %1534 = vrot.lane.b32.xlu0 %v3593_v20, %s2805_s17 }
 0x235   : > { %1536 = vrot.lane.b32.xlu2 %v3595_v36, %s2805_s17 }
 0x23c   : > { %1538 = vrot.lane.b32.xlu1 %v3603_v61, %s2805_s17  ;;  %1488 = vrot.lane.b32.xlu0 %v3593_v20, %s2801_s11 }
 0x23d   : > { %1490 = vrot.lane.b32.xlu2 %v3595_v36, %s2801_s11 }
 0x244   : > { %1492 = vrot.lane.b32.xlu1 %v3603_v61, %s2801_s11  ;;  %1540 = vrot.lane.b32.xlu0 %v3611_v0, %s2805_s17 }
 0x245   : > { %1542 = vrot.lane.b32.xlu2 %v1446_v6, %s2805_s17 }
 0x24c   : > { %1544 = vrot.lane.b32.xlu1 %v1447_v55, %s2805_s17  ;;  %1494 = vrot.lane.b32.xlu0 %v3611_v0, %s2801_s11 }
 0x24d   : > { %1496 = vrot.lane.b32.xlu2 %v1446_v6, %s2801_s11 }
 0x254   : > { %1498 = vrot.lane.b32.xlu1 %v1447_v55, %s2801_s11  ;;  %1546 = vrot.lane.b32.xlu0 %v1449_v38, %s2805_s17 }
 0x255   : > { %1548 = vrot.lane.b32.xlu2 %v1450_v24, %s2805_s17  ;;  %v2568_v24 = vld [vmem:[%s4160_s3 + $0x20] sm:$0xff] }
 0x256   : > { %1903 = vmatpush.msrb.mxu3 %v2568_v24 }
 0x25c   : > { %1470 = vrot.lane.b32.xlu1 %v3625_v60, %s2801_s11  ;;  %1468 = vrot.lane.b32.xlu0 %v3627_v26, %s2801_s11 }
 0x25d   : > { %1518 = vrot.lane.b32.xlu2 %v1428_v48, %s2805_s17 }
 0x264   : > { %1740 = vrot.lane.b32.xlu1 %v3634_v17, %s2801_s11  ;;  %1520 = vrot.lane.b32.xlu0 %v1429_v33, %s2805_s17 }
 0x265   : > { %1765 = vrot.lane.b32.xlu2 %v3639_v39, %s2805_s17 }
 0x26c   : > { %1474 = vrot.lane.b32.xlu1 %v1429_v33, %s2801_s11  ;;  %1472 = vrot.lane.b32.xlu0 %v1428_v48, %s2801_s11 }
 0x26d   : > { %1522 = vrot.lane.b32.xlu2 %v3565_v21, %s2805_s17 }
 0x274   : > { %1742 = vrot.lane.b32.xlu1 %v3639_v39, %s2801_s11  ;;  %1524 = vrot.lane.b32.xlu0 %v3563_v10, %s2805_s17 }
 0x275   : > { %1767 = vrot.lane.b32.xlu2 %v3654_v44, %s2805_s17 }
 0x277   : > { %v1481_v13 = vpop.permute.xlu2 %1480 }
 0x27c   : > { %1769 = vrot.lane.b32.xlu1 %v3667_v52, %s2805_s17  ;;  %1744 = vrot.lane.b32.xlu0 %v3654_v44, %s2801_s11 }
 0x27d   : > { %1746 = vrot.lane.b32.xlu2 %v3667_v52, %s2801_s11 }
 0x27f   : > { %v1531_v29 = vpop.permute.xlu2 %1530 }
 0x284   : > { %1748 = vrot.lane.b32.xlu1 %v3675_v30, %s2801_s11  ;;  %1771 = vrot.lane.b32.xlu0 %v3675_v30, %s2805_s17 }
 0x285   : > { %1773 = vrot.lane.b32.xlu2 %v3681_v42, %s2805_s17 }
 0x287   : > { %v1485_v19 = vpop.permute.xlu2 %1484 }
 0x288   : > { %v1574_v24 = vsel %vm546_vm2, %v3571_v32, %v1485_v19 }
 0x28c   : > { %1775 = vrot.lane.b32.xlu1 %v3685_v4, %s2805_s17  ;;  %1750 = vrot.lane.b32.xlu0 %v3681_v42, %s2801_s11 }
 0x28d   : > { %1752 = vrot.lane.b32.xlu2 %v3685_v4, %s2801_s11 }
 0x28e   : > { %v1479_v18 = vpop.permute.xlu1 %1478  ;;  %v1477_v56 = vpop.permute.xlu0 %1476 }
 0x28f   : > { %v1571_v23 = vsel %vm546_vm2, %v1429_v33, %v1479_v18  ;;  %v1570_v22 = vsel %vm546_vm2, %v1428_v48, %v1477_v56  ;;  %v1537_v38 = vpop.permute.xlu2 %1536  ;;  %v1572_v48 = vsel %vm546_vm2, %v3565_v21, %v1481_v13 }
 0x290   : > { %v1589_v56 = vsel %vm1582_vm9, %v1572_v48, %v1531_v29 }
 0x291   : > { %v2017_v13 = vrot.slane %v1589_v56, 2 }
 0x294   : > { %1754 = vrot.lane.b32.xlu1 %v1448_v7, %s2801_s11  ;;  %1777 = vrot.lane.b32.xlu0 %v1448_v7, %s2805_s17 }
 0x295   : > { %1779 = vrot.lane.b32.xlu2 %v1451_v46, %s2805_s17 }
 0x296   : > { %v1529_v47 = vpop.permute.xlu1 %1528  ;;  %v1527_v51 = vpop.permute.xlu0 %1526 }
 0x297   : > { %v1587_v6 = vsel %vm1582_vm9, %v1570_v22, %v1527_v51  ;;  %v3700_v55 = vsel %vm1582_vm9, %v1571_v23, %v1529_v47  ;;  %v1828_v23 = vrot.slane %v1589_v56, 1  ;;  %v1491_v47 = vpop.permute.xlu2 %1490 }
 0x298   : > { %2555 = vmatmul.msk.f32.vlgmr.msra.gmra.mxu3 %vm1602_vm10, %v1587_v6  ;;  %v2012_v33 = vrot.slane %v1587_v6, 2  ;;  %v4179_v12 = vrot.slane %v3700_v55, 2  ;;  %v1823_v16 = vrot.slane %v1587_v6, 1  ;;  %v4173_v1 = vrot.slane %v3700_v55, 1 }
 0x29a   : > { %v3713_v14 = vsel %vm1066_vm5, %v2012_v33, %v4179_v12  ;;  %v3718_v18 = vsel %vm832_vm4, %v1823_v16, %v4173_v1 }
 0x29e   : > { %v1533_v7 = vpop.permute.xlu1 %1532  ;;  %v1483_v46 = vpop.permute.xlu0 %1482 }
 0x29f   : > { %v1573_v21 = vsel %vm546_vm2, %v3563_v10, %v1483_v46  ;;  %v1543_v1 = vpop.permute.xlu2 %1542 }
 0x2a0   : > { %2556 = vmatmul.msk.f32.gmra.mxu3 %vm1602_vm10, %v3700_v55  ;;  %v3726_v22 = vsel %vm1582_vm9, %v1573_v21, %v1533_v7 }
 0x2a1   : > { %v4176_v51 = vrot.slane %v3726_v22, 2  ;;  %v4172_v6 = vrot.slane %v3726_v22, 1 }
 0x2a3   : > { %v3733_v29 = vsel %vm1066_vm5, %v2017_v13, %v4176_v51  ;;  %v3738_v10 = vsel %vm832_vm4, %v1828_v23, %v4172_v6 }
 0x2a6   : > { %v1487_v33 = vpop.permute.xlu1 %1486  ;;  %v1535_v16 = vpop.permute.xlu0 %1534 }
 0x2a7   : > { %v1575_v48 = vsel %vm546_vm2, %v3575_v25, %v1487_v33  ;;  %v1591_v7 = vsel %vm1582_vm9, %v1574_v24, %v1535_v16  ;;  %v2588_v24 = vld [vmem:[%s4160_s3 + $0x40] sm:$0xff]  ;;  %v1577_v16 = vsel %vm546_vm2, %v3585_v62, %v1491_v47  ;;  %v2567_v47 = vld [vmem:[%s4160_s3 + $0x18] sm:$0xff] }
 0x2a8   : > { %2557 = vmatmul.msk.f32.gmra.mxu3 %vm1602_vm10, %v1589_v56  ;;  %v3747_v46 = vsel %vm1582_vm9, %v1575_v48, %v1537_v38  ;;  %v2022_v21 = vrot.slane %v1591_v7, 2  ;;  %v1833_v13 = vrot.slane %v1591_v7, 1  ;;  %2091 = vmatpush.msrb.mxu0 %v2588_v24  ;;  %v1497_v48 = vpop.permute.xlu2 %1496  ;;  %v2586_v24 = vld [vmem:[%s4160_s3 + $0x30] sm:$0xff] }
 0x2a9   : > { %v4175_v23 = vrot.slane %v3747_v46, 2  ;;  %v4174_v6 = vrot.slane %v3747_v46, 1  ;;  %1904 = vmatpush.msrb.mxu3 %v2567_v47 }
 0x2ab   : > { %v3754_v32 = vsel %vm1066_vm5, %v2022_v21, %v4175_v23  ;;  %v3759_v25 = vsel %vm832_vm4, %v1833_v13, %v4174_v6 }
 0x2ae   : > { %v1539_v19 = vpop.permute.xlu1 %1538  ;;  %v1489_v38 = vpop.permute.xlu0 %1488 }
 0x2af   : > { %v1576_v56 = vsel %vm546_vm2, %v3577_v15, %v1489_v38  ;;  %v2587_v38 = vld [vmem:[%s4160_s3 + $0x38] sm:$0xff] }
 0x2b0   : > { %2558 = vmatmul.msk.f32.gmra.mxu3 %vm1602_vm10, %v3726_v22  ;;  %v1593_v33 = vsel %vm1582_vm9, %v1576_v56, %v1539_v19  ;;  %2092 = vmatpush.msrb.mxu0 %v2587_v38  ;;  %v1549_v51 = vpop.permute.xlu2 %1548 }
 0x2b1   : > { %v2027_v6 = vrot.slane %v1593_v33, 2  ;;  %v1838_v23 = vrot.slane %v1593_v33, 1 }
 0x2b2   : > { %2093 = vmatpush.msrb.mxu0 %v2586_v24 }
 0x2b6   : > { %v1493_v21 = vpop.permute.xlu1 %1492  ;;  %v1541_v13 = vpop.permute.xlu0 %1540 }
 0x2b7   : > { %v3772_v15 = vsel %vm1582_vm9, %v1577_v16, %v1541_v13  ;;  %v1578_v62 = vsel %vm546_vm2, %v3593_v20, %v1493_v21 }
 0x2b8   : > { %2559 = vmatmul.msk.f32.gmra.mxu3 %vm1602_vm10, %v1591_v7  ;;  %v4177_v19 = vrot.slane %v3772_v15, 2  ;;  %v4178_v56 = vrot.slane %v3772_v15, 1  ;;  %v1595_v20 = vsel %vm1582_vm9, %v1578_v62, %v1543_v1  ;;  %v1580_v62 = vsel %vm546_vm2, %v3603_v61, %v1497_v48  ;;  %v1519_v57 = vpop.permute.xlu2 %1518 }
 0x2b9   : > { %v1843_v47 = vrot.slane %v1595_v20, 1  ;;  %v2032_v24 = vrot.slane %v1595_v20, 2 }
 0x2ba   : > { %v3791_v7 = vsel %vm1066_vm5, %v2027_v6, %v4177_v19  ;;  %v3796_v16 = vsel %vm832_vm4, %v1838_v23, %v4178_v56 }
 0x2be   : > { %v1545_v21 = vpop.permute.xlu1 %1544  ;;  %v1495_v13 = vpop.permute.xlu0 %1494 }
 0x2bf   : > { %v1579_v38 = vsel %vm546_vm2, %v3595_v36, %v1495_v13 }
 0x2c0   : > { %2560 = vmatmul.msk.f32.gmra.mxu3 %vm1602_vm10, %v3747_v46  ;;  %v3804_v6 = vsel %vm1582_vm9, %v1579_v38, %v1545_v21 }
 0x2c1   : > { %v4182_v19 = vrot.slane %v3804_v6, 1  ;;  %v4180_v23 = vrot.slane %v3804_v6, 2 }
 0x2c3   : > { %v3811_v1 = vsel %vm1066_vm5, %v2032_v24, %v4180_v23  ;;  %v3816_v36 = vsel %vm832_vm4, %v1843_v47, %v4182_v19 }
 0x2c6   : > { %v1499_v13 = vpop.permute.xlu1 %1498  ;;  %v1547_v21 = vpop.permute.xlu0 %1546 }
 0x2c7   : > { %v1581_v38 = vsel %vm546_vm2, %v3611_v0, %v1499_v13  ;;  %v1597_v56 = vsel %vm1582_vm9, %v1580_v62, %v1547_v21  ;;  %v1423_v21 = vld [vmem:[#allocation4 + $0x8] sm:$0xff] }
 0x2c8   : > { %2561 = vmatmul.msk.f32.gmra.mxu3 %vm1602_vm10, %v1593_v33  ;;  %v1848_v12 = vrot.slane %v1597_v56, 1  ;;  %v3825_v24 = vsel %vm1582_vm9, %v1581_v38, %v1549_v51  ;;  %v2037_v23 = vrot.slane %v1597_v56, 2  ;;  %v1422_v33 = vld [vmem:[#allocation4] sm:$0xff] }
 0x2c9   : > { %v4185_v47 = vrot.slane %v3825_v24, 1  ;;  %v4183_v19 = vrot.slane %v3825_v24, 2 }
 0x2cb   : > { %v3832_v61 = vsel %vm1066_vm5, %v2037_v23, %v4183_v19  ;;  %v3837_v0 = vsel %vm832_vm4, %v1848_v12, %v4185_v47  ;;  %v1766_v23 = vpop.permute.xlu2 %1765  ;;  %v1424_v19 = vld [vmem:[#allocation4 + $0x10] sm:$0x3] }
 0x2ce   : > { %v1471_v48 = vpop.permute.xlu1 %1470  ;;  %v1469_v51 = vpop.permute.xlu0 %1468 }
 0x2cf   : > { %v1566_v62 = vsel %vm546_vm2, %v1422_v33, %v1469_v51  ;;  %v1567_v38 = vsel %vm546_vm2, %v1423_v21, %v1471_v48 }
 0x2d0   : > { %v1583_v13 = vsel %vm1582_vm9, %v1566_v62, %v1519_v57  ;;  %2562 = vmatmul.msk.f32.gmra.mxu3 %vm1602_vm10, %v3772_v15 }
 0x2d1   : > { %2551 = vmatmul.msk.f32.vlgmr.msrb.gmra.mxu1 %vm1602_vm10, %v1583_v13  ;;  %v2002_v47 = vrot.slane %v1583_v13, 2 }
 0x2d3   : > { %v1523_v62 = vpop.permute.xlu2 %1522 }
 0x2d6   : > { %v1741_v53 = vpop.permute.xlu1 %1740  ;;  %v1521_v12 = vpop.permute.xlu0 %1520 }
 0x2d7   : > { %v1789_v11 = vsel %vm546_vm2, %v1424_v19, %v1741_v53  ;;  %v1584_v8 = vsel %vm1582_vm9, %v1567_v38, %v1521_v12 }
 0x2d8   : > { %2563 = vmatmul.msk.f32.gmra.mxu3 %vm1602_vm10, %v1595_v20  ;;  %v2003_v57 = vrot.slane %v1584_v8, 2  ;;  %v1797_v33 = vsel %vm1582_vm9, %v1789_v11, %v1766_v23 }
 0x2d9   : > { %2552 = vmatmul.msk.f32.gmra.mxu1 %vm1602_vm10, %v1584_v8  ;;  %v2005_v48 = vrot.slane %v1797_v33, 2 }
 0x2da   : > { %v2004_v51 = vsel %vm1066_vm5, %v2002_v47, %v2003_v57 }
 0x2db   : > { %2589 = vmatmul.msk.f32.vlgmr.msrb.gmra.mxu0 %vm1602_vm10, %v2004_v51  ;;  %v2006_v11 = vsel %vm1066_vm5, %v2003_v57, %v2005_v48  ;;  %v1768_v12 = vpop.permute.xlu2 %1767 }
 0x2de   : > { %v1475_v21 = vpop.permute.xlu1 %1474  ;;  %v1473_v9 = vpop.permute.xlu0 %1472 }
 0x2df   : > { %v1568_v53 = vsel %vm546_vm2, %v3627_v26, %v1473_v9  ;;  %v1569_v20 = vsel %vm546_vm2, %v3625_v60, %v1475_v21  ;;  %v1814_v21 = vrot.slane %v1584_v8, 1 }
 0x2e0   : > { %v1585_v19 = vsel %vm1582_vm9, %v1568_v53, %v1523_v62  ;;  %2564 = vmatmul.msk.f32.gmra.mxu3 %vm1602_vm10, %v3804_v6  ;;  %v1813_v62 = vrot.slane %v1583_v13, 1  ;;  %v4203_v13 = vrot.slane %v3700_v55, 2 }
 0x2e1   : > { %2553 = vmatmul.msk.f32.gmra.mxu1 %vm1602_vm10, %v1585_v19  ;;  %v2007_v38 = vrot.slane %v1585_v19, 2 }
 0x2e2   : > { %v1815_v53 = vsel %vm832_vm4, %v1813_v62, %v1814_v21  ;;  %v2266_v62 = vadd.f32 %v3023_v35, %v3000_v28  ;;  %v4204_v28 = vrot.slane %v3726_v22, 2 }
 0x2e3   : > { %2590 = vmatmul.msk.f32.gmra.mxu0 %vm1602_vm10, %v2006_v11 }
 0x2e4   : > { %2279 = vst.msk [vmem:[#allocation6 - $0x1] sm:$0xfe] %vm2278_vm11, %v2266_v62 }
 0x2e6   : > { %v1743_v47 = vpop.permute.xlu1 %1742  ;;  %v1525_v23 = vpop.permute.xlu0 %1524 }
 0x2e7   : > { %v1790_v9 = vsel %vm546_vm2, %v3634_v17, %v1743_v47  ;;  %v1586_v26 = vsel %vm1582_vm9, %v1569_v20, %v1525_v23  ;;  %v1816_v47 = vrot.slane %v1797_v33, 1 }
 0x2e8   : > { %2565 = vmatmul.msk.f32.gmra.mxu3 %vm1602_vm10, %v1597_v56  ;;  %v2008_v51 = vrot.slane %v1586_v26, 2  ;;  %v1798_v57 = vsel %vm1582_vm9, %v1790_v9, %v1768_v12  ;;  %v1819_v12 = vrot.slane %v1586_v26, 1 }
 0x2e9   : > { %2554 = vmatmul.msk.f32.gmra.mxu1 %vm1602_vm10, %v1586_v26  ;;  %v2010_v60 = vrot.slane %v1798_v57, 2  ;;  %v1817_v8 = vsel %vm832_vm4, %v1814_v21, %v1816_v47  ;;  %v2268_v26 = vadd.f32 %v3032_v37, %v3011_v31  ;;  %v2315_v31 = vld [vmem:[%s4162_s5] sm:$0xf] }
 0x2ea   : > { %v2009_v48 = vsel %vm1066_vm5, %v2007_v38, %v2008_v51  ;;  %2605 = vmatpush.msk.msra.mxu1 %vm630_vm0, %v2315_v31 }
 0x2eb   : > { %2591 = vmatmul.msk.f32.gmra.mxu0 %vm1602_vm10, %v2009_v48  ;;  %v2011_v17 = vsel %vm1066_vm5, %v2008_v51, %v2010_v60  ;;  %v1747_v51 = vpop.permute.xlu2 %1746  ;;  %v1821_v60 = vrot.slane %v1798_v57, 1  ;;  %2282 = vst.msk [vmem:[#allocation6 + $0xf] sm:$0x1] %vm2281_vm12, %v2268_v26 }
 0x2ec   : > { %v1792_v48 = vsel %vm546_vm2, %v3654_v44, %v1747_v51 }
 0x2ed   : > { %v1822_v57 = vsel %vm832_vm4, %v1819_v12, %v1821_v60 }
 0x2ee   : > { %v1745_v56 = vpop.permute.xlu0 %1744  ;;  %v1770_v11 = vpop.permute.xlu1 %1769 }
 0x2ef   : > { %v1791_v20 = vsel %vm546_vm2, %v3639_v39, %v1745_v56  ;;  %v1818_v39 = vrot.slane %v1585_v19, 1  ;;  %v2267_v19 = vadd.f32 %v3021_v34, %v2998_v27 }
 0x2f0   : > { %2566 = vmatmul.msk.f32.gmra.mxu3 %vm1602_vm10, %v3825_v24  ;;  %v1799_v23 = vsel %vm1582_vm9, %v1791_v20, %v1770_v11 }
 0x2f1   : > { %v2015_v38 = vrot.slane %v1799_v23, 2  ;;  %v1820_v33 = vsel %vm832_vm4, %v1818_v39, %v1819_v12  ;;  %2280 = vst.msk [vmem:[#allocation6 + $0x7] sm:$0xff] %vm525_vm1, %v2267_v19  ;;  %v1826_v47 = vrot.slane %v1799_v23, 1 }
 0x2f3   : > { %2592 = vmatmul.msk.f32.gmra.mxu0 %vm1602_vm10, %v2011_v17  ;;  %v2016_v9 = vsel %vm1066_vm5, %v4203_v13, %v2015_v38  ;;  %v1774_v56 = vpop.permute.xlu2 %1773 }
 0x2f6   : > { %v1749_v34 = vpop.permute.xlu1 %1748 }
 0x2f7   : > { %v1793_v21 = vsel %vm546_vm2, %v3667_v52, %v1749_v34 }
 0x2f8   : > { %2570 = vmatmul.msk.f32.vlgmr.msrb.gmra.mxu3 %vm1602_vm10, %v1815_v53  ;;  %v2292_v35 = vld [vmem:[#allocation6] ss:$2 sm:$0xff]  ;;  %v2300_v37 = vld [vmem:[#allocation6 + $0x1] ss:$2 sm:$0xff]  ;;  %v1801_v11 = vsel %vm1582_vm9, %v1793_v21, %v1774_v56  ;;  %v2272_v21 = vadd.f32 %v2930_v3, %v3098_v59  ;;  %v2273_v56 = vadd.f32 %v2928_v2, %v3096_v58  ;;  %v4212_v2 = vrot.slane %v3825_v24, 2 }
 0x2f9   : > { %v2025_v38 = vrot.slane %v1801_v11, 2  ;;  %v1836_v19 = vrot.slane %v1801_v11, 1 }
 0x2fa   : > { %2286 = vst.msk [vmem:[#allocation6 + $0x1f] sm:$0xfe] %vm2278_vm11, %v2272_v21 }
 0x2fb   : > { %2593 = vmatmul.msk.f32.gmra.mxu0 %vm1602_vm10, %v3713_v14  ;;  %v1772_v14 = vpop.permute.xlu0 %1771  ;;  %2287 = vst.msk [vmem:[#allocation6 + $0x27] sm:$0xff] %vm525_vm1, %v2273_v56  ;;  %v4042_v56 = vld [vmem:[%s4161_s4] ss:$0 sm:$0xff] }
 0x2fc   : > { %v1800_v17 = vsel %vm1582_vm9, %v1792_v48, %v1772_v14  ;;  %v2270_v48 = vadd.f32 %v3071_v49, %v3042_v40  ;;  %v2271_v14 = vadd.f32 %v3086_v54, %v3053_v43  ;;  %v4208_v40 = vrot.slane %v3772_v15, 2  ;;  %v1753_v54 = vpop.permute.xlu2 %1752 }
 0x2fd   : > { %v2020_v44 = vrot.slane %v1800_v17, 2 }
 0x2fe   : > { %v1776_v23 = vpop.permute.xlu1 %1775  ;;  %2284 = vst.msk [vmem:[#allocation6 + $0x17] sm:$0xff] %vm525_vm1, %v2270_v48  ;;  %v4218_v48 = vld [vmem:[#allocation16_spill] sm:$0xff] }
 0x2ff   : > { %v2021_v27 = vsel %vm1066_vm5, %v4204_v28, %v2020_v44  ;;  %2285 = vst.msk [vmem:[#allocation6 + $0x1f] sm:$0x1] %vm2281_vm12, %v2271_v14  ;;  %v4209_v28 = vrot.slane %v3747_v46, 1 }
 0x300   : > { %2571 = vmatmul.msk.f32.gmra.mxu3 %vm1602_vm10, %v1817_v8  ;;  %v4205_v8 = vrot.slane %v3700_v55, 1  ;;  %v1831_v55 = vrot.slane %v1800_v17, 1 }
 0x302   : > { %v1827_v52 = vsel %vm832_vm4, %v4205_v8, %v1826_v47  ;;  %v2296_v59 = vld [vmem:[#allocation6 + $0x20] ss:$2 sm:$0xff] }
 0x303   : > { %2594 = vmatmul.msk.f32.gmra.mxu0 %vm1602_vm10, %v2016_v9 }
 0x308   : > { %2572 = vmatmul.msk.f32.gmra.mxu3 %vm1602_vm10, %v1820_v33  ;;  %v2269_v33 = vadd.f32 %v3073_v50, %v3044_v41 }
 0x30a   : > { %2283 = vst.msk [vmem:[#allocation6 + $0xf] sm:$0xfe] %vm2278_vm11, %v2269_v33  ;;  %v4217_v33 = vld [vmem:[#allocation15_spill] sm:$0xff] }
 0x30b   : > { %2595 = vmatmul.msk.f32.gmra.mxu0 %vm1602_vm10, %v3733_v29  ;;  %v2307_v29 = vadd.f32 %v2300_v37, %v2292_v35  ;;  %v1780_v35 = vpop.permute.xlu2 %1779  ;;  %v2277_v14 = vadd.f32 %v4218_v48, %v4217_v33 }
 0x30d   : > { %v2311_v53 = vmul.f32 0.25, %v2307_v29  ;;  %2291 = vst.msk [vmem:[#allocation6 + $0x3f] sm:$0x1] %vm2281_vm12, %v2277_v14 }
 0x30f   : > { %2606 = vmatmul.msk.f32.vlgmr.msra.gmra.mxu1 %vm525_vm1, %v2311_v53 }
 0x310   : > { %2573 = vmatmul.msk.f32.gmra.mxu3 %vm1602_vm10, %v1822_v57 }
 0x311   : > { %v2294_v49 = vld [vmem:[#allocation6 + $0x10] ss:$2 sm:$0xff]  ;;  %v2302_v50 = vld [vmem:[#allocation6 + $0x11] ss:$2 sm:$0xff] }
 0x312   : > { %v2308_v60 = vadd.f32 %v2302_v50, %v2294_v49 }
 0x313   : > { %2596 = vmatmul.msk.f32.gmra.mxu0 %vm1602_vm10, %v2021_v27 }
 0x314   : > { %v2312_v62 = vmul.f32 0.25, %v2308_v60 }
 0x317   : > { %2607 = vmatmul.msk.f32.gmra.mxu1 %vm525_vm1, %v2312_v62 }
 0x318   : > { %2574 = vmatmul.msk.f32.gmra.mxu3 %vm1602_vm10, %v3718_v18  ;;  %v4206_v18 = vrot.slane %v3747_v46, 2 }
 0x31a   : > { %v2026_v13 = vsel %vm1066_vm5, %v4206_v18, %v2025_v38 }
 0x31b   : > { %v1680_v20 = vpop.f32.mrf.mxu3  ;;  %2597 = vmatmul.msk.f32.gmra.mxu0 %vm1602_vm10, %v3754_v32  ;;  %v1751_v32 = vpop.permute.xlu0 %1750 }
 0x31c   : > { %1720 = vst.msk [vmem:[#allocation3 + $0x20] sm:$0xff] %vm546_vm2, %v1680_v20  ;;  %v1794_v39 = vsel %vm546_vm2, %v3675_v30, %v1751_v32 }
 0x31d   : > { %v1802_v12 = vsel %vm1582_vm9, %v1794_v39, %v1776_v23 }
 0x31e   : > { %v2030_v30 = vrot.slane %v1802_v12, 2  ;;  %v1841_v29 = vrot.slane %v1802_v12, 1  ;;  %v4216_v12 = vld [vmem:[#allocation14_spill] sm:$0xff] }
 0x320   : > { %2575 = vmatmul.msk.f32.gmra.mxu3 %vm1602_vm10, %v1827_v52  ;;  %v2031_v41 = vsel %vm1066_vm5, %v4208_v40, %v2030_v30  ;;  %v4213_v52 = vrot.slane %v3804_v6, 1  ;;  %v4219_v30 = vrot.slane %v3825_v24, 1 }
 0x323   : > { %v1683_v9 = vpop.f32.mrf.mxu3  ;;  %2598 = vmatmul.msk.f32.gmra.mxu0 %vm1602_vm10, %v2026_v13  ;;  %v1778_v17 = vpop.permute.xlu0 %1777  ;;  %v1958_v21 = vld [vmem:[#allocation3 + $0x20] sm:$0xff] }
 0x324   : > { %1721 = vst.msk [vmem:[#allocation3 + $0x28] sm:$0xff] %vm546_vm2, %v1683_v9 }
 0x328   : > { %2576 = vmatmul.msk.f32.gmra.mxu3 %vm1602_vm10, %v3738_v10  ;;  %v4207_v10 = vrot.slane %v3726_v22, 1  ;;  %v1795_v22 = vsel %vm546_vm2, %v3681_v42, %v1753_v54  ;;  %v1837_v42 = vsel %vm832_vm4, %v4209_v28, %v1836_v19 }
 0x329   : > { %v1803_v26 = vsel %vm1582_vm9, %v1795_v22, %v1778_v17 }
 0x32a   : > { %v2035_v57 = vrot.slane %v1803_v26, 2  ;;  %v1846_v47 = vrot.slane %v1803_v26, 1 }
 0x32b   : > { %v1686_v51 = vpop.f32.mrf.mxu3  ;;  %2599 = vmatmul.msk.f32.gmra.mxu0 %vm1602_vm10, %v3791_v7  ;;  %v1832_v7 = vsel %vm832_vm4, %v4207_v10, %v1831_v55  ;;  %v4215_v55 = vld [vmem:[#allocation12_spill] sm:$0xff] }
 0x32c   : > { %1722 = vst.msk [vmem:[#allocation3 + $0x30] sm:$0xff] %vm546_vm2, %v1686_v51  ;;  %v1847_v18 = vsel %vm832_vm4, %v4213_v52, %v1846_v47  ;;  %v2276_v51 = vadd.f32 %v4216_v12, %v4215_v55  ;;  %v4059_v55 = vld [vmem:[%s4163_s6] ss:$0 sm:$0xff] }
 0x32e   : > { %2290 = vst.msk [vmem:[#allocation6 + $0x37] sm:$0xff] %vm525_vm1, %v2276_v51 }
 0x330   : > { %2577 = vmatmul.msk.f32.gmra.mxu3 %vm1602_vm10, %v1832_v7 }
 0x333   : > { %v1689_v43 = vpop.f32.mrf.mxu3  ;;  %2600 = vmatmul.msk.f32.gmra.mxu0 %vm1602_vm10, %v2031_v41 }
 0x334   : > { %1723 = vst.msk [vmem:[#allocation3 + $0x38] sm:$0xff] %vm546_vm2, %v1689_v43 }
 0x338   : > { %2578 = vmatmul.msk.f32.gmra.mxu3 %vm1602_vm10, %v3759_v25  ;;  %v4210_v25 = vrot.slane %v3804_v6, 2  ;;  %v4214_v6 = vld [vmem:[#allocation13_spill] sm:$0xff] }
 0x339   : > { %v2275_v39 = vadd.f32 %v4214_v6, %v2933_v5 }
 0x33a   : > { %v2036_v27 = vsel %vm1066_vm5, %v4210_v25, %v2035_v57 }
 0x33b   : > { %v1692_v44 = vpop.f32.mrf.mxu3  ;;  %2601 = vmatmul.msk.f32.gmra.mxu0 %vm1602_vm10, %v3811_v1  ;;  %v1755_v1 = vpop.permute.xlu1 %1754  ;;  %2289 = vst.msk [vmem:[#allocation6 + $0x2f] sm:$0xfe] %vm2278_vm11, %v2275_v39  ;;  %v1961_v33 = vld [vmem:[#allocation3 + $0x38] sm:$0xff] }
 0x33c   : > { %1724 = vst.msk [vmem:[#allocation3 + $0x40] sm:$0xff] %vm546_vm2, %v1692_v44  ;;  %v1796_v34 = vsel %vm546_vm2, %v3685_v4, %v1755_v1  ;;  %v2274_v4 = vadd.f32 %v3158_v45, %v3107_v63 }
 0x33d   : > { %v1804_v46 = vsel %vm1582_vm9, %v1796_v34, %v1780_v35 }
 0x33e   : > { %2288 = vst.msk [vmem:[#allocation6 + $0x2f] sm:$0x1] %vm2281_vm12, %v2274_v4  ;;  %v1851_v32 = vrot.slane %v1804_v46, 1 }
 0x340   : > { %2579 = vmatmul.msk.f32.gmra.mxu3 %vm1602_vm10, %v1837_v42 }
 0x342   : > { %v2298_v7 = vld [vmem:[#allocation6 + $0x30] ss:$2 sm:$0xff]  ;;  %v2306_v40 = vld [vmem:[#allocation6 + $0x31] ss:$2 sm:$0xff] }
 0x343   : > { %v1695_v31 = vpop.f32.mrf.mxu3  ;;  %2602 = vmatmul.msk.f32.gmra.mxu0 %vm1602_vm10, %v2036_v27  ;;  %v2310_v41 = vadd.f32 %v2306_v40, %v2298_v7 }
 0x344   : > { %1725 = vst.msk [vmem:[#allocation3 + $0x48] sm:$0xff] %vm546_vm2, %v1695_v31 }
 0x345   : > { %v2304_v45 = vld [vmem:[#allocation6 + $0x21] ss:$2 sm:$0xff]  ;;  %v2314_v43 = vmul.f32 0.25, %v2310_v41 }
 0x348   : > { %2580 = vmatmul.msk.f32.gmra.mxu3 %vm1602_vm10, %v3796_v16  ;;  %v2040_v16 = vrot.slane %v1804_v46, 2 }
 0x34a   : > { %v2041_v3 = vsel %vm1066_vm5, %v4212_v2, %v2040_v16 }
 0x34b   : > { %v1698_v37 = vpop.f32.mrf.mxu3  ;;  %2603 = vmatmul.msk.f32.gmra.mxu0 %vm1602_vm10, %v3832_v61  ;;  %v4211_v61 = vrot.slane %v3772_v15, 1  ;;  %v2309_v15 = vadd.f32 %v2304_v45, %v2296_v59  ;;  %v1959_v45 = vld [vmem:[#allocation3 + $0x28] sm:$0xff] }
 0x34c   : > { %1726 = vst.msk [vmem:[#allocation3 + $0x50] sm:$0xff] %vm546_vm2, %v1698_v37 }
 0x34d   : > { %v1842_v11 = vsel %vm832_vm4, %v4211_v61, %v1841_v29  ;;  %v2313_v20 = vmul.f32 0.25, %v2309_v15 }
 0x34e   : > { %v1668_v53 = vpop.f32.mrf.mxu1 }
 0x34f   : > { %1716 = vst.msk [vmem:[#allocation3] sm:$0xff] %vm546_vm2, %v1668_v53  ;;  %2608 = vmatmul.msk.f32.gmra.mxu1 %vm525_vm1, %v2313_v20 }
 0x350   : > { %2581 = vmatmul.msk.f32.gmra.mxu3 %vm1602_vm10, %v1842_v11 }
 0x353   : > { %v1701_v58 = vpop.f32.mrf.mxu3  ;;  %2604 = vmatmul.msk.f32.gmra.mxu0 %vm1602_vm10, %v2041_v3 }
 0x354   : > { %1727 = vst.msk [vmem:[#allocation3 + $0x58] sm:$0xff] %vm546_vm2, %v1701_v58 }
 0x356   : > { %v1671_v63 = vpop.f32.mrf.mxu1  ;;  %v1954_v54 = vld [vmem:[#allocation3] sm:$0xff] }
 0x357   : > { %1717 = vst.msk [vmem:[#allocation3 + $0x8] sm:$0xff] %vm546_vm2, %v1671_v63  ;;  %2609 = vmatmul.msk.f32.gmra.mxu1 %vm525_vm1, %v2314_v43 }
 0x358   : > { %2582 = vmatmul.msk.f32.gmra.mxu3 %vm1602_vm10, %v3816_v36  ;;  %v2095_v9 = vpop.f32.mrf.mxu0 }
 0x35b   : > { %v1704_v38 = vpop.f32.mrf.mxu3 }
 0x35c   : > { %1728 = vst.msk [vmem:[#allocation3 + $0x60] sm:$0xff] %vm546_vm2, %v1704_v38 }
 0x35e   : > { %v1674_v8 = vpop.f32.mrf.mxu1  ;;  %v1955_v22 = vld [vmem:[#allocation3 + $0x8] sm:$0xff] }
 0x35f   : > { %1718 = vst.msk [vmem:[#allocation3 + $0x10] sm:$0xff] %vm546_vm2, %v1674_v8 }
 0x360   : > { %2583 = vmatmul.msk.f32.gmra.mxu3 %vm1602_vm10, %v1847_v18  ;;  %v2098_v5 = vpop.f32.mrf.mxu0 }
 0x363   : > { %v1707_v13 = vpop.f32.mrf.mxu3 }
 0x364   : > { %1729 = vst.msk [vmem:[#allocation3 + $0x68] sm:$0xff] %vm546_vm2, %v1707_v13 }
 0x366   : > { %v1677_v36 = vpop.f32.mrf.mxu1  ;;  %v1956_v57 = vld [vmem:[#allocation3 + $0x10] sm:$0xff] }
 0x367   : > { %1719 = vst.msk [vmem:[#allocation3 + $0x18] sm:$0xff] %vm546_vm2, %v1677_v36 }
 0x368   : > { %2584 = vmatmul.msk.f32.gmra.mxu3 %vm1602_vm10, %v3837_v0  ;;  %v1852_v0 = vsel %vm832_vm4, %v4219_v30, %v1851_v32  ;;  %v2101_v49 = vpop.f32.mrf.mxu0 }
 0x36b   : > { %v1710_v23 = vpop.f32.mrf.mxu3 }
 0x36c   : > { %1730 = vst.msk [vmem:[#allocation3 + $0x70] sm:$0xff] %vm546_vm2, %v1710_v23 }
 0x36e   : > { %v1957_v1 = vld [vmem:[#allocation3 + $0x18] sm:$0xff] }
 0x370   : > { %2585 = vmatmul.msk.f32.gmra.mxu3 %vm1602_vm10, %v1852_v0  ;;  %v2104_v62 = vpop.f32.mrf.mxu0 }
 0x373   : > { %v1713_v10 = vpop.f32.mrf.mxu3 }
 0x374   : > { %1731 = vst.msk [vmem:[#allocation3 + $0x78] sm:$0xff] %vm546_vm2, %v1713_v10 }
 0x378   : > { %v2107_v27 = vpop.f32.mrf.mxu0 }
 0x37b   : > { %v1906_v50 = vpop.f32.mrf.mxu3 }
 0x37c   : > { %v1970_v24 = vadd.f32 %v1954_v54, %v1906_v50  ;;  %v1962_v50 = vld [vmem:[#allocation3 + $0x40] sm:$0xff] }
 0x37e   : > { %1986 = vst.msk [vmem:[#allocation3] sm:$0xff] %vm546_vm2, %v1970_v24 }
 0x380   : > { %v2110_v37 = vpop.f32.mrf.mxu0 }
 0x383   : > { %v1909_v60 = vpop.f32.mrf.mxu3 }
 0x384   : > { %v1971_v17 = vadd.f32 %v1955_v22, %v1909_v60 }
 0x385   : > { %v2143_v19 = vld [vmem:[#allocation3] sm:$0xff] }
 0x386   : > { %v2159_v26 = vadd.f32 %v2143_v19, %v2095_v9  ;;  %1987 = vst.msk [vmem:[#allocation3 + $0x8] sm:$0xff] %vm546_vm2, %v1971_v17  ;;  %v1960_v9 = vld [vmem:[#allocation3 + $0x30] sm:$0xff] }
 0x388   : > { %2175 = vst.msk [vmem:[#allocation3] sm:$0xff] %vm546_vm2, %v2159_v26  ;;  %v2113_v59 = vpop.f32.mrf.mxu0 }
 0x38b   : > { %v1912_v44 = vpop.f32.mrf.mxu3 }
 0x38c   : > { %v1972_v28 = vadd.f32 %v1956_v57, %v1912_v44  ;;  %v2352_v12 = vpop.f32.mrf.mxu1 }
 0x38d   : > { %v2144_v42 = vld [vmem:[#allocation3 + $0x8] sm:$0xff] }
 0x38e   : > { %v2160_v25 = vadd.f32 %v2144_v42, %v2098_v5  ;;  %1988 = vst.msk [vmem:[#allocation3 + $0x10] sm:$0xff] %vm546_vm2, %v1972_v28  ;;  %v2353_v5 = vadd.f32 %v4059_v55, %v2352_v12  ;;  %v1963_v28 = vld [vmem:[#allocation3 + $0x48] sm:$0xff] }
 0x38f   : > { %v2191_v16 = vld [vmem:[#allocation3] sm:$0xff] }
 0x390   : > { %2176 = vst.msk [vmem:[#allocation3 + $0x8] sm:$0xff] %vm546_vm2, %v2160_v25  ;;  %v2211_v2 = vadd.f32 %v4042_v56, %v2191_v16  ;;  %v2116_v23 = vpop.f32.mrf.mxu0 }
 0x393   : > { %v1915_v31 = vpop.f32.mrf.mxu3 }
 0x394   : > { %v1973_v34 = vadd.f32 %v1957_v1, %v1915_v31 }
 0x395   : > { %v2145_v35 = vld [vmem:[#allocation3 + $0x10] sm:$0xff] }
 0x396   : > { %v2161_v46 = vadd.f32 %v2145_v35, %v2101_v49  ;;  %1989 = vst.msk [vmem:[#allocation3 + $0x18] sm:$0xff] %vm546_vm2, %v1973_v34 }
 0x397   : > { %v2192_v20 = vld [vmem:[#allocation3 + $0x8] sm:$0xff] }
 0x398   : > { %2177 = vst.msk [vmem:[#allocation3 + $0x10] sm:$0xff] %vm546_vm2, %v2161_v46  ;;  %v2212_v52 = vadd.f32 %v4042_v56, %v2192_v20  ;;  %v2119_v41 = vpop.f32.mrf.mxu0 }
 0x39b   : > { %v1918_v29 = vpop.f32.mrf.mxu3 }
 0x39c   : > { %v1974_v4 = vadd.f32 %v1958_v21, %v1918_v29  ;;  %v1964_v21 = vld [vmem:[#allocation3 + $0x50] sm:$0xff] }
 0x39d   : > { %v2146_v53 = vld [vmem:[#allocation3 + $0x18] sm:$0xff] }
 0x39e   : > { %v2162_v61 = vadd.f32 %v2146_v53, %v2104_v62  ;;  %1990 = vst.msk [vmem:[#allocation3 + $0x20] sm:$0xff] %vm546_vm2, %v1974_v4 }
 0x39f   : > { %v2193_v11 = vld [vmem:[#allocation3 + $0x10] sm:$0xff] }
 0x3a0   : > { %v2213_v3 = vadd.f32 %v4042_v56, %v2193_v11  ;;  %2178 = vst.msk [vmem:[#allocation3 + $0x18] sm:$0xff] %vm546_vm2, %v2162_v61  ;;  %v2122_v26 = vpop.f32.mrf.mxu0  ;;  %v2355_v61 = vpop.f32.mrf.mxu1 }
 0x3a2   : > { %v2227_v58 = vadd.f32 %v2213_v3, %v2211_v2  ;;  %v1965_v2 = vld [vmem:[#allocation3 + $0x58] sm:$0xff] }
 0x3a3   : > { %v1921_v63 = vpop.f32.mrf.mxu3 }
 0x3a4   : > { %v1975_v15 = vadd.f32 %v1959_v45, %v1921_v63  ;;  %2235 = vst.msk [vmem:[#allocation5] sm:$0xff] %vm546_vm2, %v2227_v58  ;;  %v2356_v45 = vadd.f32 %v4059_v55, %v2355_v61 }
 0x3a5   : > { %v2147_v47 = vld [vmem:[#allocation3 + $0x20] sm:$0xff] }
 0x3a6   : > { %v2163_v38 = vadd.f32 %v2147_v47, %v2107_v27  ;;  %1991 = vst.msk [vmem:[#allocation3 + $0x28] sm:$0xff] %vm546_vm2, %v1975_v15 }
 0x3a7   : > { %v2194_v8 = vld [vmem:[#allocation3 + $0x18] sm:$0xff] }
 0x3a8   : > { %v2214_v18 = vadd.f32 %v4042_v56, %v2194_v8  ;;  %2179 = vst.msk [vmem:[#allocation3 + $0x20] sm:$0xff] %vm546_vm2, %v2163_v38 }
 0x3aa   : > { %v2228_v13 = vadd.f32 %v2214_v18, %v2212_v52  ;;  %v1966_v18 = vld [vmem:[#allocation3 + $0x60] sm:$0xff] }
 0x3ab   : > { %v1924_v36 = vpop.f32.mrf.mxu3 }
 0x3ac   : > { %v1976_v32 = vadd.f32 %v1960_v9, %v1924_v36  ;;  %2236 = vst.msk [vmem:[#allocation5 + $0x8] sm:$0xff] %vm546_vm2, %v2228_v13 }
 0x3ad   : > { %v2148_v6 = vld [vmem:[#allocation3 + $0x28] sm:$0xff] }
 0x3ae   : > { %v2164_v39 = vadd.f32 %v2148_v6, %v2110_v37  ;;  %1992 = vst.msk [vmem:[#allocation3 + $0x30] sm:$0xff] %vm546_vm2, %v1976_v32  ;;  %v2125_v37 = vpop.f32.mrf.mxu0 }
 0x3af   : > { %v2195_v24 = vld [vmem:[#allocation3 + $0x20] sm:$0xff] }
 0x3b0   : > { %2180 = vst.msk [vmem:[#allocation3 + $0x28] sm:$0xff] %vm546_vm2, %v2164_v39  ;;  %v2215_v62 = vadd.f32 %v4042_v56, %v2195_v24 }
 0x3b3   : > { %v1927_v51 = vpop.f32.mrf.mxu3  ;;  %v2243_v48 = vld [vmem:[#allocation5] ss:$2 sm:$0xff]  ;;  %v2251_v14 = vld [vmem:[#allocation5 + $0x1] ss:$2 sm:$0xff] }
 0x3b4   : > { %v1977_v30 = vadd.f32 %v1961_v33, %v1927_v51  ;;  %v2258_v0 = vadd.f32 %v2251_v14, %v2243_v48  ;;  %v1967_v48 = vld [vmem:[#allocation3 + $0x68] sm:$0xff] }
 0x3b5   : > { %v2149_v10 = vld [vmem:[#allocation3 + $0x30] sm:$0xff] }
 0x3b6   : > { %v2165_v7 = vadd.f32 %v2149_v10, %v2113_v59  ;;  %1993 = vst.msk [vmem:[#allocation3 + $0x38] sm:$0xff] %vm546_vm2, %v1977_v30  ;;  %v2262_v40 = vmul.f32 0.25, %v2258_v0  ;;  %v2128_v15 = vpop.f32.mrf.mxu0 }
 0x3b7   : > { %v2196_v25 = vld [vmem:[#allocation3 + $0x28] sm:$0xff] }
 0x3b8   : > { %2181 = vst.msk [vmem:[#allocation3 + $0x30] sm:$0xff] %vm546_vm2, %v2165_v7  ;;  %v2364_v43 = vadd.f32 %v2353_v5, %v2262_v40  ;;  %v2216_v34 = vadd.f32 %v4042_v56, %v2196_v25 }
 0x3ba   : > { %2368 = vst.msk [vmem:[%s3555_s9] sm:$0xff] %vm546_vm2, %v2364_v43 }
 0x3bb   : > { %v1930_v49 = vpop.f32.mrf.mxu3 }
 0x3bc   : > { %v1978_v54 = vadd.f32 %v1962_v50, %v1930_v49  ;;  %v1968_v50 = vld [vmem:[#allocation3 + $0x70] sm:$0xff] }
 0x3bd   : > { %v2150_v60 = vld [vmem:[#allocation3 + $0x38] sm:$0xff] }
 0x3be   : > { %v2166_v22 = vadd.f32 %v2150_v60, %v2116_v23  ;;  %1994 = vst.msk [vmem:[#allocation3 + $0x40] sm:$0xff] %vm546_vm2, %v1978_v54  ;;  %v2131_v23 = vpop.f32.mrf.mxu0 }
 0x3bf   : > { %v2197_v17 = vld [vmem:[#allocation3 + $0x30] sm:$0xff] }
 0x3c0   : > { %v2217_v19 = vadd.f32 %v4042_v56, %v2197_v17  ;;  %2182 = vst.msk [vmem:[#allocation3 + $0x38] sm:$0xff] %vm546_vm2, %v2166_v22 }
 0x3c2   : > { %v2229_v44 = vadd.f32 %v2217_v19, %v2215_v62  ;;  %v1969_v19 = vld [vmem:[#allocation3 + $0x78] sm:$0xff] }
 0x3c3   : > { %v1933_v57 = vpop.f32.mrf.mxu3 }
 0x3c4   : > { %v1979_v42 = vadd.f32 %v1963_v28, %v1933_v57  ;;  %2237 = vst.msk [vmem:[#allocation5 + $0x10] sm:$0xff] %vm546_vm2, %v2229_v44 }
 0x3c5   : > { %v2151_v27 = vld [vmem:[#allocation3 + $0x40] sm:$0xff] }
 0x3c6   : > { %v2167_v31 = vadd.f32 %v2151_v27, %v2119_v41  ;;  %1995 = vst.msk [vmem:[#allocation3 + $0x48] sm:$0xff] %vm546_vm2, %v1979_v42  ;;  %v2134_v41 = vpop.f32.mrf.mxu0 }
 0x3c7   : > { %v2198_v1 = vld [vmem:[#allocation3 + $0x38] sm:$0xff] }
 0x3c8   : > { %v2218_v35 = vadd.f32 %v4042_v56, %v2198_v1  ;;  %2183 = vst.msk [vmem:[#allocation3 + $0x40] sm:$0xff] %vm546_vm2, %v2167_v31 }
 0x3ca   : > { %v2230_v46 = vadd.f32 %v2218_v35, %v2216_v34 }
 0x3cb   : > { %v1936_v29 = vpop.f32.mrf.mxu3 }
 0x3cc   : > { %v1980_v4 = vadd.f32 %v1964_v21, %v1936_v29  ;;  %2238 = vst.msk [vmem:[#allocation5 + $0x18] sm:$0xff] %vm546_vm2, %v2230_v46  ;;  %v2358_v22 = vpop.f32.mrf.mxu1 }
 0x3cd   : > { %v2152_v16 = vld [vmem:[#allocation3 + $0x48] sm:$0xff]  ;;  %v2359_v42 = vadd.f32 %v4059_v55, %v2358_v22 }
 0x3ce   : > { %v2168_v53 = vadd.f32 %v2152_v16, %v2122_v26  ;;  %1996 = vst.msk [vmem:[#allocation3 + $0x50] sm:$0xff] %vm546_vm2, %v1980_v4  ;;  %v2137_v17 = vpop.f32.mrf.mxu0 }
 0x3cf   : > { %v2199_v36 = vld [vmem:[#allocation3 + $0x40] sm:$0xff] }
 0x3d0   : > { %2184 = vst.msk [vmem:[#allocation3 + $0x48] sm:$0xff] %vm546_vm2, %v2168_v53  ;;  %v2219_v39 = vadd.f32 %v4042_v56, %v2199_v36 }
 0x3d3   : > { %v1939_v11 = vpop.f32.mrf.mxu3  ;;  %v2245_v3 = vld [vmem:[#allocation5 + $0x10] ss:$2 sm:$0xff]  ;;  %v2253_v58 = vld [vmem:[#allocation5 + $0x11] ss:$2 sm:$0xff] }
 0x3d4   : > { %v1981_v59 = vadd.f32 %v1965_v2, %v1939_v11  ;;  %v2259_v63 = vadd.f32 %v2253_v58, %v2245_v3  ;;  %v2361_v58 = vpop.f32.mrf.mxu1 }
 0x3d5   : > { %v2153_v20 = vld [vmem:[#allocation3 + $0x50] sm:$0xff] }
 0x3d6   : > { %v2169_v47 = vadd.f32 %v2153_v20, %v2125_v37  ;;  %1997 = vst.msk [vmem:[#allocation3 + $0x58] sm:$0xff] %vm546_vm2, %v1981_v59  ;;  %v2263_v38 = vmul.f32 0.25, %v2259_v63  ;;  %v2140_v34 = vpop.f32.mrf.mxu0 }
 0x3d7   : > { %v2200_v30 = vld [vmem:[#allocation3 + $0x48] sm:$0xff] }
 0x3d8   : > { %2185 = vst.msk [vmem:[#allocation3 + $0x50] sm:$0xff] %vm546_vm2, %v2169_v47  ;;  %v2365_v8 = vadd.f32 %v2356_v45, %v2263_v38  ;;  %v2220_v7 = vadd.f32 %v4042_v56, %v2200_v30 }
 0x3da   : > { %2369 = vst.msk [vmem:[%s3555_s9 + $0x8] sm:$0xff] %vm546_vm2, %v2365_v8 }
 0x3db   : > { %v1942_v52 = vpop.f32.mrf.mxu3 }
 0x3dc   : > { %v1982_v13 = vadd.f32 %v1966_v18, %v1942_v52 }
 0x3dd   : > { %v2154_v9 = vld [vmem:[#allocation3 + $0x58] sm:$0xff] }
 0x3de   : > { %v2170_v32 = vadd.f32 %v2154_v9, %v2128_v15  ;;  %1998 = vst.msk [vmem:[#allocation3 + $0x60] sm:$0xff] %vm546_vm2, %v1982_v13 }
 0x3df   : > { %v2201_v6 = vld [vmem:[#allocation3 + $0x50] sm:$0xff] }
 0x3e0   : > { %v2221_v12 = vadd.f32 %v4042_v56, %v2201_v6  ;;  %2186 = vst.msk [vmem:[#allocation3 + $0x58] sm:$0xff] %vm546_vm2, %v2170_v32 }
 0x3e2   : > { %v2231_v51 = vadd.f32 %v2221_v12, %v2219_v39 }
 0x3e3   : > { %v1945_v33 = vpop.f32.mrf.mxu3 }
 0x3e4   : > { %v1983_v14 = vadd.f32 %v1967_v48, %v1945_v33  ;;  %2239 = vst.msk [vmem:[#allocation5 + $0x20] sm:$0xff] %vm546_vm2, %v2231_v51 }
 0x3e5   : > { %v2155_v0 = vld [vmem:[#allocation3 + $0x60] sm:$0xff] }
 0x3e6   : > { %v2171_v5 = vadd.f32 %v2155_v0, %v2131_v23  ;;  %1999 = vst.msk [vmem:[#allocation3 + $0x68] sm:$0xff] %vm546_vm2, %v1983_v14 }
 0x3e7   : > { %v2202_v10 = vld [vmem:[#allocation3 + $0x58] sm:$0xff] }
 0x3e8   : > { %v2222_v40 = vadd.f32 %v4042_v56, %v2202_v10  ;;  %2187 = vst.msk [vmem:[#allocation3 + $0x60] sm:$0xff] %vm546_vm2, %v2171_v5 }
 0x3ea   : > { %v2232_v43 = vadd.f32 %v2222_v40, %v2220_v7 }
 0x3eb   : > { %v1948_v49 = vpop.f32.mrf.mxu3 }
 0x3ec   : > { %v1984_v54 = vadd.f32 %v1968_v50, %v1948_v49  ;;  %2240 = vst.msk [vmem:[#allocation5 + $0x28] sm:$0xff] %vm546_vm2, %v2232_v43 }
 0x3ed   : > { %v2156_v24 = vld [vmem:[#allocation3 + $0x68] sm:$0xff] }
 0x3ee   : > { %v2172_v60 = vadd.f32 %v2156_v24, %v2134_v41  ;;  %2000 = vst.msk [vmem:[#allocation3 + $0x70] sm:$0xff] %vm546_vm2, %v1984_v54 }
 0x3ef   : > { %v2203_v35 = vld [vmem:[#allocation3 + $0x60] sm:$0xff] }
 0x3f0   : > { %2188 = vst.msk [vmem:[#allocation3 + $0x68] sm:$0xff] %vm546_vm2, %v2172_v60  ;;  %v2223_v21 = vadd.f32 %v4042_v56, %v2203_v35 }
 0x3f3   : > { %v1951_v62 = vpop.f32.mrf.mxu3  ;;  %v2247_v26 = vld [vmem:[#allocation5 + $0x20] ss:$2 sm:$0xff]  ;;  %v2255_v44 = vld [vmem:[#allocation5 + $0x21] ss:$2 sm:$0xff] }
 0x3f4   : > { %v1985_v57 = vadd.f32 %v1969_v19, %v1951_v62  ;;  %v2260_v28 = vadd.f32 %v2255_v44, %v2247_v26 }
 0x3f5   : > { %v2157_v25 = vld [vmem:[#allocation3 + $0x70] sm:$0xff] }
 0x3f6   : > { %v2173_v27 = vadd.f32 %v2157_v25, %v2137_v17  ;;  %2001 = vst.msk [vmem:[#allocation3 + $0x78] sm:$0xff] %vm546_vm2, %v1985_v57  ;;  %v2264_v31 = vmul.f32 0.25, %v2260_v28 }
 0x3f7   : > { %v2204_v53 = vld [vmem:[#allocation3 + $0x68] sm:$0xff] }
 0x3f8   : > { %2189 = vst.msk [vmem:[#allocation3 + $0x70] sm:$0xff] %vm546_vm2, %v2173_v27  ;;  %v2366_v1 = vadd.f32 %v2359_v42, %v2264_v31  ;;  %v2224_v11 = vadd.f32 %v4042_v56, %v2204_v53 }
 0x3fa   : > { %2370 = vst.msk [vmem:[%s3555_s9 + $0x10] sm:$0xff] %vm546_vm2, %v2366_v1 }
 0x3fd   : > { %v2158_v46 = vld [vmem:[#allocation3 + $0x78] sm:$0xff] }
 0x3fe   : > { %v2174_v37 = vadd.f32 %v2158_v46, %v2140_v34 }
 0x3ff   : > { %v2205_v29 = vld [vmem:[#allocation3 + $0x70] sm:$0xff] }
 0x400   : > { %v2225_v4 = vadd.f32 %v4042_v56, %v2205_v29  ;;  %2190 = vst.msk [vmem:[#allocation3 + $0x78] sm:$0xff] %vm546_vm2, %v2174_v37 }
 0x402   : > { %v2233_v16 = vadd.f32 %v2225_v4, %v2223_v21 }
 0x404   : > { %2241 = vst.msk [vmem:[#allocation5 + $0x30] sm:$0xff] %vm546_vm2, %v2233_v16 }
 0x407   : > { %v2206_v61 = vld [vmem:[#allocation3 + $0x78] sm:$0xff] }
 0x408   : > { %v2226_v2 = vadd.f32 %v4042_v56, %v2206_v61  ;;  %v2362_v56 = vadd.f32 %v4059_v55, %v2361_v58 }
 0x40a   : > { %v2234_v3 = vadd.f32 %v2226_v2, %v2224_v11 }
 0x40c   : > { %2242 = vst.msk [vmem:[#allocation5 + $0x38] sm:$0xff] %vm546_vm2, %v2234_v3 }
 0x413   : > { %v2249_v59 = vld [vmem:[#allocation5 + $0x30] ss:$2 sm:$0xff]  ;;  %v2257_v63 = vld [vmem:[#allocation5 + $0x31] ss:$2 sm:$0xff] }
 0x414   : > { %v2261_v45 = vadd.f32 %v2257_v63, %v2249_v59 }
 0x416   : > { %v2265_v15 = vmul.f32 0.25, %v2261_v45 }
 0x418   : > { %v2367_v20 = vadd.f32 %v2362_v56, %v2265_v15 }
 0x41a   : > { %2371 = vst.msk [vmem:[%s3555_s9 + $0x18] sm:$0xff] %vm546_vm2, %v2367_v20 }
 0x41b   : > { %2731 = shalt.err (!%p2728_p10)
}
 0x41c   : > { %s2806_s12 = smov 128  }
 0x41d   : > { %2623 = dma.vmem_to_hbm [thread:$0]  (%p2898_p3), %s2388_s27, 512, %s2390_s28, %s2373_s22, %s2806_s12, %s2806_s12, %s2801_s11  }
 0x41e PF: > { %p2629_p11 = scmp.ge.s32.totalorder %s2798_s8, 2  ;;  %s2404_s9 = sand.u32 1, %s2770_s24  }
 0x41f   : > { %s2405_s21 = scalar_lea.sflag [#allocation8], %s2404_s9 }
 0x420   : > { %p2626_p12 = pnand %p2629_p11, %p2907_p8 }
 0x422   : > { %p2627_p13 = pneg %p2626_p12 }
 0x424   : > { %2765 = dma.done.wait (%p2627_p13), %s2405_s21, 512  }
 0x425   : > { %2767 = vsyncadd (%p2627_p13), %s2405_s21, 4294966784  ;;  %s20_s8 = sadd.s32 1, %s2798_s8   ;;  %s4220_s14 = sld [smem:[#allocation10_spill]] }
 0x426   : > { %p17_p0 = scmp.ge.s32.totalorder %s20_s8, 6   ;;  %s4221_s11 = sld [smem:[#allocation11_spill]] }
 0x427   : > { %s4222_s24 = smov %s2774_s25  ;;  %s4223_s25 = smov %s2778_s26 }
 0x428   : > { %s4224_s26 = smov %s2916_s19  ;;  %s4225_s27 = smov %s2790_s29 }
 0x429   : > { %s4226_s28 = smov %s2794_s30  ;;  %19 = sbr.rel (!%p17_p0) target bundleno = 5 (0x5), region = 110 }
 0x42b   : > { %s4227_s29 = smov %s4220_s14 }
 0x42c   : > { %s4228_s30 = smov %s4221_s11 }
 0x42e   :  { %2411 = vsyncpa [#allocation8], 1 }
 0x42f   :  { %2413 = vsyncpa [#allocation8 + $0x1], 1 }

</bundles_post_ra>
